<compile_context>
chip_gen: v5e
topology: v5e:2x2
jax: 0.10.0
libtpu: 0.0.40
codegen_flags: <defaults>
</compile_context>

<pallas_src>
import functools

import jax
import jax.numpy as jnp
from jax import lax
from jax.experimental import pallas as pl
from jax.experimental.pallas import tpu as pltpu


def _round_up(x, m):
    return ((x + m - 1) // m) * m


def _ssmm_kernel(q_ref, s_ref, bias_ref, o_ref, *, neighbor_k, patch_num, p_pad,
                 q_tile, m_pad, way):
    """One (batch, query-tile) grid step.

    q_ref:    (1, R, D)           zero-padded, flattened query patches (R = q_tile*p_pad)
    s_ref:    (1, D, way*m_pad)   support patches, transposed + zero-padded per class
    bias_ref: (1, way*m_pad)      0 for real support columns, -inf for padded columns
    o_ref:    (1, 1, q_tile, way) mean top-k similarity (f32)
    """
    R = q_tile * p_pad
    neg_inf = jnp.float32(-jnp.inf)

    q = q_ref[0]                                      # (R, D)
    s = s_ref[0]                                      # (D, way*m_pad)

    # One wide MXU matmul for all classes (f32 accumulation), then mask the
    # zero-padded support columns to -inf with a single hoisted broadcast add.
    scores = jnp.dot(q, s, preferred_element_type=jnp.float32)   # (R, way*m_pad)
    scores = scores + bias_ref[...]

    totals = []
    for j in range(way):                              # way is small (e.g. 5)
        x = scores[:, j * m_pad:(j + 1) * m_pad]      # lane-aligned class slice (R, m_pad)
        total = jnp.zeros((R, 1), jnp.float32)
        rem = jnp.full((R, 1), float(neighbor_k), dtype=jnp.float32)
        for step in range(neighbor_k):                # neighbor_k is tiny (e.g. 3)
            m = jnp.max(x, axis=1, keepdims=True)                          # (R, 1)
            eq = x == m
            cnt = jnp.sum(eq.astype(jnp.float32), axis=1, keepdims=True)   # tie count
            take = jnp.minimum(cnt, rem)
            # Guard take == 0 (row fully masked => m == -inf) so m * 0 never NaNs.
            total = total + jnp.where(take > 0, m * take, 0.0)
            rem = rem - take
            if step + 1 < neighbor_k:                 # last mask pass is dead work
                x = jnp.where(eq, neg_inf, x)
        totals.append(total)

    tot = jnp.concatenate(totals, axis=1)             # (R, way)
    # Per-query sum over patch rows: sublane-only reshape (p_pad % 8 == 0) + reduce.
    # Exact because zero-padded query rows produce exactly-zero top-k sums.
    per_query = tot.reshape(q_tile, p_pad, way).sum(axis=1)       # (q_tile, way)
    per_query = per_query * jnp.float32(1.0 / (patch_num * neighbor_k))
    o_ref[...] = per_query.reshape(1, 1, q_tile, way).astype(o_ref.dtype)


def _vmem_config():
    """(score-block byte target, vmem_limit_bytes) for the local TPU generation."""
    try:
        cap = int(pltpu.get_tpu_info().vmem_capacity_bytes)
    except Exception:
        return 8 << 20, 48 << 20           # unknown generation: conservative defaults
    if cap <= (64 << 20):                  # v7x-class: 64 MiB VMEM, 2 TensorCores
        return 8 << 20, 40 << 20
    return 32 << 20, 96 << 20              # v5e / v6e: 128 MiB VMEM -> bigger tiles


def _choose_q_tile(n_wq, p_pad, n_pad, batch, q_tile, score_budget):
    if q_tile is not None:
        return max(1, min(q_tile, n_wq))
    # Budget the f32 (q_tile*p_pad, way*m_pad) score block.
    rows = max(p_pad, score_budget // (n_pad * 4))
    qt = max(1, rows // p_pad)
    # Keep >= ~4 grid steps so both v7x TensorCores get work and the pipeliner has
    # steps to double-buffer (also hides the query-block DMA on v5e/v6e).
    min_steps = 4
    if batch < min_steps:
        tiles_wanted = -(-min_steps // batch)
        qt = min(qt, max(1, -(-n_wq // tiles_wanted)))
    return min(qt, n_wq)


def local_patch_classifier(query_fea, support_fea, neighbor_k=3, *,
                           q_tile=None, compute_dtype=jnp.bfloat16):
    """Pallas implementation of localPatchClassifier.forward.

    Returns (batch * n_wq, way) similarities, rows ordered [b0/q0, b0/q1, ..., b1/q0, ...]
    exactly like the PyTorch torch.cat. Torch-exact numerics require compute_dtype=float32
    (the bf16 default trades last-bit accuracy for MXU throughput).
    """
    batch, way, shot, patch_num, dim = support_fea.shape
    qb, n_wq, qp, qd = query_fea.shape
    assert qb == batch and qp == patch_num and qd == dim, "shape mismatch"
    M = shot * patch_num
    assert neighbor_k <= M, "neighbor_k must be <= shot * patch_num"

    p_pad = _round_up(patch_num, 8)        # sublane padding of query patch rows
    m_pad = _round_up(M, 128)              # per-class lane padding (128 is enough on v5e)
    n_pad = way * m_pad

    score_budget, vmem_limit = _vmem_config()
    qt = _choose_q_tile(n_wq, p_pad, n_pad, batch, q_tile, score_budget)
    n_tiles = -(-n_wq // qt)
    n_wq_pad = n_tiles * qt
    R = qt * p_pad

    # --- queries: ZERO-pad (exact zeros are required for the segment-sum trick),
    # flatten to MXU-shaped (R, D) tiles, cast to the compute dtype (half the DMA bytes).
    q = query_fea
    if n_wq_pad != n_wq or p_pad != patch_num:
        q = jnp.pad(q, ((0, 0), (0, n_wq_pad - n_wq), (0, p_pad - patch_num), (0, 0)))
    q_flat = q.reshape(batch, n_wq_pad * p_pad, dim).astype(compute_dtype)

    # --- support: (batch, way, M, D) -> zero-pad M to a 128 multiple -> (batch, D, way*m_pad)
    # so the kernel's rhs already has the contraction dim leading (no in-kernel transpose).
    support = support_fea.reshape(batch, way, M, dim)
    if m_pad != M:
        support = jnp.pad(support, ((0, 0), (0, 0), (0, m_pad - M), (0, 0)))
    s_fused = jnp.transpose(support, (0, 3, 1, 2)).reshape(batch, dim, n_pad)
    s_fused = s_fused.astype(compute_dtype)

    # --- -inf bias for the zero-padded support columns (hoisted, built once).
    col = jnp.arange(n_pad, dtype=jnp.int32) % m_pad
    bias = jnp.where(col < M, 0.0, -jnp.inf).astype(jnp.float32).reshape(1, n_pad)

    grid = (batch, n_tiles)
    kernel = functools.partial(_ssmm_kernel, neighbor_k=neighbor_k,
                               patch_num=patch_num, p_pad=p_pad, q_tile=qt,
                               m_pad=m_pad, way=way)

    itemsize = jnp.dtype(compute_dtype).itemsize
    cost = pl.CostEstimate(
        flops=2 * batch * n_tiles * R * dim * n_pad,
        transcendentals=0,
        bytes_accessed=(q_flat.size * itemsize + s_fused.size * itemsize
                        + bias.size * 4 + batch * n_wq_pad * way * 4))

    out = pl.pallas_call(
        kernel,
        out_shape=jax.ShapeDtypeStruct((batch, n_tiles, qt, way), jnp.float32),
        grid_spec=pltpu.PrefetchScalarGridSpec(
            num_scalar_prefetch=0,
            grid=grid,
            in_specs=[
                pl.BlockSpec((1, R, dim), lambda b, t: (b, t, 0)),
                # Support block stays resident across the query-tile axis.
                # TODO(synk): single-buffer this block (pipeline_mode=pl.Buffered(1)) on
                # v7x to halve its VMEM footprint; it only changes at batch boundaries.
                pl.BlockSpec((1, dim, n_pad), lambda b, t: (b, 0, 0)),
                pl.BlockSpec((1, n_pad), lambda b, t: (0, 0)),
            ],
            out_specs=pl.BlockSpec((1, 1, qt, way), lambda b, t: (b, t, 0, 0)),
        ),
        compiler_params=pltpu.CompilerParams(
            dimension_semantics=("parallel", "parallel"),
            vmem_limit_bytes=vmem_limit),
        cost_estimate=cost,
    )(q_flat, s_fused, bias)

    out = out.reshape(batch, n_wq_pad, way)[:, :n_wq, :]
    return out.reshape(batch * n_wq, way)


def _reference(query_fea, support_fea, neighbor_k=3):
    """Pure-JAX reference mirroring the PyTorch semantics."""
    batch, way, shot, P, D = support_fea.shape
    support = support_fea.reshape(batch, way, shot * P, D)
    ip = jnp.einsum("bqpd,bwmd->bqwpm", query_fea, support)
    topv = lax.top_k(ip, neighbor_k)[0]                        # (..., P, k)
    sim = jnp.mean(topv, axis=(-2, -1))                        # (batch, n_wq, way)
    return sim.reshape(batch * query_fea.shape[1], way)


if __name__ == "__main__":
    key = jax.random.PRNGKey(0)
    kq, ks = jax.random.split(key)
    batch, n_wq, way, shot, patch_num, dim = 2, 4, 5, 2, 9, 64

    query = jax.random.normal(kq, (batch, n_wq, patch_num, dim), jnp.float32)
    support = jax.random.normal(ks, (batch, way, shot, patch_num, dim), jnp.float32)

    ref = _reference(query, support, neighbor_k=3)

    # Exact (f32-matmul) path: tight check against the pure-JAX reference.
    out_f32 = jax.block_until_ready(
        local_patch_classifier(query, support, neighbor_k=3,
                               compute_dtype=jnp.float32))
    assert out_f32.shape == (batch * n_wq, way), out_f32.shape
    assert jnp.allclose(out_f32, ref, atol=1e-3, rtol=1e-4), (out_f32, ref)

    # Default fast path (bf16 matmul inputs, f32 accumulation): looser numeric check.
    out_bf16 = jax.block_until_ready(
        local_patch_classifier(query, support, neighbor_k=3))
    assert out_bf16.shape == (batch * n_wq, way), out_bf16.shape
    assert jnp.allclose(out_bf16, ref, atol=1e-1, rtol=2e-2), (out_bf16, ref)

    print("KERNEL_OK")
</pallas_src>

<mosaic_0001>
module attributes {stable_mosaic.version = 11 : i64} {
  func.func @_ssmm_kernel(%arg0: i32, %arg1: i32, %arg2: memref<1x32x64xf32, #tpu.memory_space<vmem>>, %arg3: memref<1x64x640xf32, #tpu.memory_space<vmem>>, %arg4: memref<1x640xf32, #tpu.memory_space<vmem>>, %arg5: memref<1x1x2x5xf32, #tpu.memory_space<vmem>>) attributes {dimension_semantics = [#tpu.dimension_semantics<parallel>, #tpu.dimension_semantics<parallel>], iteration_bounds = array<i64: 2, 2>, scalar_prefetch = 0 : i64, scratch_operands = 0 : i64, tpu.core_type = #tpu.core_type<tc>, window_params = [{transform_indices = @transform_0, window_bounds = array<i64: 1, 32, 64>}, {transform_indices = @transform_1, window_bounds = array<i64: 1, 64, 640>}, {pipeline_mode = #tpu.pipeline_mode<synchronous>, transform_indices = @transform_2, window_bounds = array<i64: 1, 640>}, {transform_indices = @transform_3, window_bounds = array<i64: 1, 1, 2, 5>}]} {
    %c0 = arith.constant 0 : index
    %c0_0 = arith.constant 0 : index
    %c0_1 = arith.constant 0 : index
    %0 = vector.load %arg2[%c0, %c0_0, %c0_1] : memref<1x32x64xf32, #tpu.memory_space<vmem>>, vector<1x32x64xf32>
    %1 = vector.shape_cast %0 : vector<1x32x64xf32> to vector<32x64xf32>
    %c0_2 = arith.constant 0 : index
    %c0_3 = arith.constant 0 : index
    %c0_4 = arith.constant 0 : index
    %2 = vector.load %arg3[%c0_2, %c0_3, %c0_4] : memref<1x64x640xf32, #tpu.memory_space<vmem>>, vector<1x64x640xf32>
    %3 = vector.shape_cast %2 : vector<1x64x640xf32> to vector<64x640xf32>
    %cst = arith.constant dense<0.000000e+00> : vector<32x640xf32>
    %4 = tpu.matmul %1, %3, %cst {dimension_numbers = #tpu.dot_dimension_numbers<[1], [0], [0], [1], [0, 0, 1, 1], [], []>} : vector<32x64xf32>, vector<64x640xf32>, vector<32x640xf32> -> vector<32x640xf32>
    %c0_5 = arith.constant 0 : index
    %c0_6 = arith.constant 0 : index
    %5 = vector.load %arg4[%c0_5, %c0_6] : memref<1x640xf32, #tpu.memory_space<vmem>>, vector<1x640xf32>
    %6 = vector.broadcast %5 : vector<1x640xf32> to vector<32x640xf32>
    %7 = arith.addf %4, %6 : vector<32x640xf32>
    %8 = vector.extract_strided_slice %7 {offsets = [0, 0], sizes = [32, 128], strides = [1, 1]} : vector<32x640xf32> to vector<32x128xf32>
    %cst_7 = arith.constant 0.000000e+00 : f32
    %9 = vector.broadcast %cst_7 : f32 to vector<32x1xf32>
    %cst_8 = arith.constant 3.000000e+00 : f32
    %10 = vector.broadcast %cst_8 : f32 to vector<32x1xf32>
    %cst_9 = arith.constant dense<0xFF800000> : vector<32xf32>
    %11 = vector.multi_reduction <maximumf>, %8, %cst_9 [1] : vector<32x128xf32> to vector<32xf32>
    %12 = vector.shape_cast %11 : vector<32xf32> to vector<32x1xf32>
    %13 = vector.broadcast %12 : vector<32x1xf32> to vector<32x128xf32>
    %14 = arith.cmpf oeq, %8, %13 : vector<32x128xf32>
    %15 = arith.extui %14 : vector<32x128xi1> to vector<32x128xi32>
    %16 = arith.sitofp %15 : vector<32x128xi32> to vector<32x128xf32>
    %cst_10 = arith.constant dense<0.000000e+00> : vector<32xf32>
    %17 = vector.multi_reduction <add>, %16, %cst_10 [1] : vector<32x128xf32> to vector<32xf32>
    %18 = vector.shape_cast %17 : vector<32xf32> to vector<32x1xf32>
    %19 = arith.minimumf %18, %10 : vector<32x1xf32>
    %cst_11 = arith.constant 0.000000e+00 : f32
    %20 = vector.broadcast %cst_11 : f32 to vector<32x1xf32>
    %21 = arith.cmpf ogt, %19, %20 : vector<32x1xf32>
    %22 = arith.mulf %12, %19 : vector<32x1xf32>
    %cst_12 = arith.constant 0.000000e+00 : f32
    %23 = vector.broadcast %cst_12 : f32 to vector<32x1xf32>
    %24 = arith.select %21, %22, %23 : vector<32x1xi1>, vector<32x1xf32>
    %25 = arith.addf %9, %24 : vector<32x1xf32>
    %26 = arith.subf %10, %19 : vector<32x1xf32>
    %cst_13 = arith.constant 0xFF800000 : f32
    %27 = vector.broadcast %cst_13 : f32 to vector<32x128xf32>
    %28 = arith.select %14, %27, %8 : vector<32x128xi1>, vector<32x128xf32>
    %cst_14 = arith.constant dense<0xFF800000> : vector<32xf32>
    %29 = vector.multi_reduction <maximumf>, %28, %cst_14 [1] : vector<32x128xf32> to vector<32xf32>
    %30 = vector.shape_cast %29 : vector<32xf32> to vector<32x1xf32>
    %31 = vector.broadcast %30 : vector<32x1xf32> to vector<32x128xf32>
    %32 = arith.cmpf oeq, %28, %31 : vector<32x128xf32>
    %33 = arith.extui %32 : vector<32x128xi1> to vector<32x128xi32>
    %34 = arith.sitofp %33 : vector<32x128xi32> to vector<32x128xf32>
    %cst_15 = arith.constant dense<0.000000e+00> : vector<32xf32>
    %35 = vector.multi_reduction <add>, %34, %cst_15 [1] : vector<32x128xf32> to vector<32xf32>
    %36 = vector.shape_cast %35 : vector<32xf32> to vector<32x1xf32>
    %37 = arith.minimumf %36, %26 : vector<32x1xf32>
    %cst_16 = arith.constant 0.000000e+00 : f32
    %38 = vector.broadcast %cst_16 : f32 to vector<32x1xf32>
    %39 = arith.cmpf ogt, %37, %38 : vector<32x1xf32>
    %40 = arith.mulf %30, %37 : vector<32x1xf32>
    %cst_17 = arith.constant 0.000000e+00 : f32
    %41 = vector.broadcast %cst_17 : f32 to vector<32x1xf32>
    %42 = arith.select %39, %40, %41 : vector<32x1xi1>, vector<32x1xf32>
    %43 = arith.addf %25, %42 : vector<32x1xf32>
    %44 = arith.subf %26, %37 : vector<32x1xf32>
    %cst_18 = arith.constant 0xFF800000 : f32
    %45 = vector.broadcast %cst_18 : f32 to vector<32x128xf32>
    %46 = arith.select %32, %45, %28 : vector<32x128xi1>, vector<32x128xf32>
    %cst_19 = arith.constant dense<0xFF800000> : vector<32xf32>
    %47 = vector.multi_reduction <maximumf>, %46, %cst_19 [1] : vector<32x128xf32> to vector<32xf32>
    %48 = vector.shape_cast %47 : vector<32xf32> to vector<32x1xf32>
    %49 = vector.broadcast %48 : vector<32x1xf32> to vector<32x128xf32>
    %50 = arith.cmpf oeq, %46, %49 : vector<32x128xf32>
    %51 = arith.extui %50 : vector<32x128xi1> to vector<32x128xi32>
    %52 = arith.sitofp %51 : vector<32x128xi32> to vector<32x128xf32>
    %cst_20 = arith.constant dense<0.000000e+00> : vector<32xf32>
    %53 = vector.multi_reduction <add>, %52, %cst_20 [1] : vector<32x128xf32> to vector<32xf32>
    %54 = vector.shape_cast %53 : vector<32xf32> to vector<32x1xf32>
    %55 = arith.minimumf %54, %44 : vector<32x1xf32>
    %cst_21 = arith.constant 0.000000e+00 : f32
    %56 = vector.broadcast %cst_21 : f32 to vector<32x1xf32>
    %57 = arith.cmpf ogt, %55, %56 : vector<32x1xf32>
    %58 = arith.mulf %48, %55 : vector<32x1xf32>
    %cst_22 = arith.constant 0.000000e+00 : f32
    %59 = vector.broadcast %cst_22 : f32 to vector<32x1xf32>
    %60 = arith.select %57, %58, %59 : vector<32x1xi1>, vector<32x1xf32>
    %61 = arith.addf %43, %60 : vector<32x1xf32>
    %62 = vector.extract_strided_slice %7 {offsets = [0, 128], sizes = [32, 128], strides = [1, 1]} : vector<32x640xf32> to vector<32x128xf32>
    %cst_23 = arith.constant 0.000000e+00 : f32
    %63 = vector.broadcast %cst_23 : f32 to vector<32x1xf32>
    %cst_24 = arith.constant 3.000000e+00 : f32
    %64 = vector.broadcast %cst_24 : f32 to vector<32x1xf32>
    %cst_25 = arith.constant dense<0xFF800000> : vector<32xf32>
    %65 = vector.multi_reduction <maximumf>, %62, %cst_25 [1] : vector<32x128xf32> to vector<32xf32>
    %66 = vector.shape_cast %65 : vector<32xf32> to vector<32x1xf32>
    %67 = vector.broadcast %66 : vector<32x1xf32> to vector<32x128xf32>
    %68 = arith.cmpf oeq, %62, %67 : vector<32x128xf32>
    %69 = arith.extui %68 : vector<32x128xi1> to vector<32x128xi32>
    %70 = arith.sitofp %69 : vector<32x128xi32> to vector<32x128xf32>
    %cst_26 = arith.constant dense<0.000000e+00> : vector<32xf32>
    %71 = vector.multi_reduction <add>, %70, %cst_26 [1] : vector<32x128xf32> to vector<32xf32>
    %72 = vector.shape_cast %71 : vector<32xf32> to vector<32x1xf32>
    %73 = arith.minimumf %72, %64 : vector<32x1xf32>
    %cst_27 = arith.constant 0.000000e+00 : f32
    %74 = vector.broadcast %cst_27 : f32 to vector<32x1xf32>
    %75 = arith.cmpf ogt, %73, %74 : vector<32x1xf32>
    %76 = arith.mulf %66, %73 : vector<32x1xf32>
    %cst_28 = arith.constant 0.000000e+00 : f32
    %77 = vector.broadcast %cst_28 : f32 to vector<32x1xf32>
    %78 = arith.select %75, %76, %77 : vector<32x1xi1>, vector<32x1xf32>
    %79 = arith.addf %63, %78 : vector<32x1xf32>
    %80 = arith.subf %64, %73 : vector<32x1xf32>
    %cst_29 = arith.constant 0xFF800000 : f32
    %81 = vector.broadcast %cst_29 : f32 to vector<32x128xf32>
    %82 = arith.select %68, %81, %62 : vector<32x128xi1>, vector<32x128xf32>
    %cst_30 = arith.constant dense<0xFF800000> : vector<32xf32>
    %83 = vector.multi_reduction <maximumf>, %82, %cst_30 [1] : vector<32x128xf32> to vector<32xf32>
    %84 = vector.shape_cast %83 : vector<32xf32> to vector<32x1xf32>
    %85 = vector.broadcast %84 : vector<32x1xf32> to vector<32x128xf32>
    %86 = arith.cmpf oeq, %82, %85 : vector<32x128xf32>
    %87 = arith.extui %86 : vector<32x128xi1> to vector<32x128xi32>
    %88 = arith.sitofp %87 : vector<32x128xi32> to vector<32x128xf32>
    %cst_31 = arith.constant dense<0.000000e+00> : vector<32xf32>
    %89 = vector.multi_reduction <add>, %88, %cst_31 [1] : vector<32x128xf32> to vector<32xf32>
    %90 = vector.shape_cast %89 : vector<32xf32> to vector<32x1xf32>
    %91 = arith.minimumf %90, %80 : vector<32x1xf32>
    %cst_32 = arith.constant 0.000000e+00 : f32
    %92 = vector.broadcast %cst_32 : f32 to vector<32x1xf32>
    %93 = arith.cmpf ogt, %91, %92 : vector<32x1xf32>
    %94 = arith.mulf %84, %91 : vector<32x1xf32>
    %cst_33 = arith.constant 0.000000e+00 : f32
    %95 = vector.broadcast %cst_33 : f32 to vector<32x1xf32>
    %96 = arith.select %93, %94, %95 : vector<32x1xi1>, vector<32x1xf32>
    %97 = arith.addf %79, %96 : vector<32x1xf32>
    %98 = arith.subf %80, %91 : vector<32x1xf32>
    %cst_34 = arith.constant 0xFF800000 : f32
    %99 = vector.broadcast %cst_34 : f32 to vector<32x128xf32>
    %100 = arith.select %86, %99, %82 : vector<32x128xi1>, vector<32x128xf32>
    %cst_35 = arith.constant dense<0xFF800000> : vector<32xf32>
    %101 = vector.multi_reduction <maximumf>, %100, %cst_35 [1] : vector<32x128xf32> to vector<32xf32>
    %102 = vector.shape_cast %101 : vector<32xf32> to vector<32x1xf32>
    %103 = vector.broadcast %102 : vector<32x1xf32> to vector<32x128xf32>
    %104 = arith.cmpf oeq, %100, %103 : vector<32x128xf32>
    %105 = arith.extui %104 : vector<32x128xi1> to vector<32x128xi32>
    %106 = arith.sitofp %105 : vector<32x128xi32> to vector<32x128xf32>
    %cst_36 = arith.constant dense<0.000000e+00> : vector<32xf32>
    %107 = vector.multi_reduction <add>, %106, %cst_36 [1] : vector<32x128xf32> to vector<32xf32>
    %108 = vector.shape_cast %107 : vector<32xf32> to vector<32x1xf32>
    %109 = arith.minimumf %108, %98 : vector<32x1xf32>
    %cst_37 = arith.constant 0.000000e+00 : f32
    %110 = vector.broadcast %cst_37 : f32 to vector<32x1xf32>
    %111 = arith.cmpf ogt, %109, %110 : vector<32x1xf32>
    %112 = arith.mulf %102, %109 : vector<32x1xf32>
    %cst_38 = arith.constant 0.000000e+00 : f32
    %113 = vector.broadcast %cst_38 : f32 to vector<32x1xf32>
    %114 = arith.select %111, %112, %113 : vector<32x1xi1>, vector<32x1xf32>
    %115 = arith.addf %97, %114 : vector<32x1xf32>
    %116 = vector.extract_strided_slice %7 {offsets = [0, 256], sizes = [32, 128], strides = [1, 1]} : vector<32x640xf32> to vector<32x128xf32>
    %cst_39 = arith.constant 0.000000e+00 : f32
    %117 = vector.broadcast %cst_39 : f32 to vector<32x1xf32>
    %cst_40 = arith.constant 3.000000e+00 : f32
    %118 = vector.broadcast %cst_40 : f32 to vector<32x1xf32>
    %cst_41 = arith.constant dense<0xFF800000> : vector<32xf32>
    %119 = vector.multi_reduction <maximumf>, %116, %cst_41 [1] : vector<32x128xf32> to vector<32xf32>
    %120 = vector.shape_cast %119 : vector<32xf32> to vector<32x1xf32>
    %121 = vector.broadcast %120 : vector<32x1xf32> to vector<32x128xf32>
    %122 = arith.cmpf oeq, %116, %121 : vector<32x128xf32>
    %123 = arith.extui %122 : vector<32x128xi1> to vector<32x128xi32>
    %124 = arith.sitofp %123 : vector<32x128xi32> to vector<32x128xf32>
    %cst_42 = arith.constant dense<0.000000e+00> : vector<32xf32>
    %125 = vector.multi_reduction <add>, %124, %cst_42 [1] : vector<32x128xf32> to vector<32xf32>
    %126 = vector.shape_cast %125 : vector<32xf32> to vector<32x1xf32>
    %127 = arith.minimumf %126, %118 : vector<32x1xf32>
    %cst_43 = arith.constant 0.000000e+00 : f32
    %128 = vector.broadcast %cst_43 : f32 to vector<32x1xf32>
    %129 = arith.cmpf ogt, %127, %128 : vector<32x1xf32>
    %130 = arith.mulf %120, %127 : vector<32x1xf32>
    %cst_44 = arith.constant 0.000000e+00 : f32
    %131 = vector.broadcast %cst_44 : f32 to vector<32x1xf32>
    %132 = arith.select %129, %130, %131 : vector<32x1xi1>, vector<32x1xf32>
    %133 = arith.addf %117, %132 : vector<32x1xf32>
    %134 = arith.subf %118, %127 : vector<32x1xf32>
    %cst_45 = arith.constant 0xFF800000 : f32
    %135 = vector.broadcast %cst_45 : f32 to vector<32x128xf32>
    %136 = arith.select %122, %135, %116 : vector<32x128xi1>, vector<32x128xf32>
    %cst_46 = arith.constant dense<0xFF800000> : vector<32xf32>
    %137 = vector.multi_reduction <maximumf>, %136, %cst_46 [1] : vector<32x128xf32> to vector<32xf32>
    %138 = vector.shape_cast %137 : vector<32xf32> to vector<32x1xf32>
    %139 = vector.broadcast %138 : vector<32x1xf32> to vector<32x128xf32>
    %140 = arith.cmpf oeq, %136, %139 : vector<32x128xf32>
    %141 = arith.extui %140 : vector<32x128xi1> to vector<32x128xi32>
    %142 = arith.sitofp %141 : vector<32x128xi32> to vector<32x128xf32>
    %cst_47 = arith.constant dense<0.000000e+00> : vector<32xf32>
    %143 = vector.multi_reduction <add>, %142, %cst_47 [1] : vector<32x128xf32> to vector<32xf32>
    %144 = vector.shape_cast %143 : vector<32xf32> to vector<32x1xf32>
    %145 = arith.minimumf %144, %134 : vector<32x1xf32>
    %cst_48 = arith.constant 0.000000e+00 : f32
    %146 = vector.broadcast %cst_48 : f32 to vector<32x1xf32>
    %147 = arith.cmpf ogt, %145, %146 : vector<32x1xf32>
    %148 = arith.mulf %138, %145 : vector<32x1xf32>
    %cst_49 = arith.constant 0.000000e+00 : f32
    %149 = vector.broadcast %cst_49 : f32 to vector<32x1xf32>
    %150 = arith.select %147, %148, %149 : vector<32x1xi1>, vector<32x1xf32>
    %151 = arith.addf %133, %150 : vector<32x1xf32>
    %152 = arith.subf %134, %145 : vector<32x1xf32>
    %cst_50 = arith.constant 0xFF800000 : f32
    %153 = vector.broadcast %cst_50 : f32 to vector<32x128xf32>
    %154 = arith.select %140, %153, %136 : vector<32x128xi1>, vector<32x128xf32>
    %cst_51 = arith.constant dense<0xFF800000> : vector<32xf32>
    %155 = vector.multi_reduction <maximumf>, %154, %cst_51 [1] : vector<32x128xf32> to vector<32xf32>
    %156 = vector.shape_cast %155 : vector<32xf32> to vector<32x1xf32>
    %157 = vector.broadcast %156 : vector<32x1xf32> to vector<32x128xf32>
    %158 = arith.cmpf oeq, %154, %157 : vector<32x128xf32>
    %159 = arith.extui %158 : vector<32x128xi1> to vector<32x128xi32>
    %160 = arith.sitofp %159 : vector<32x128xi32> to vector<32x128xf32>
    %cst_52 = arith.constant dense<0.000000e+00> : vector<32xf32>
    %161 = vector.multi_reduction <add>, %160, %cst_52 [1] : vector<32x128xf32> to vector<32xf32>
    %162 = vector.shape_cast %161 : vector<32xf32> to vector<32x1xf32>
    %163 = arith.minimumf %162, %152 : vector<32x1xf32>
    %cst_53 = arith.constant 0.000000e+00 : f32
    %164 = vector.broadcast %cst_53 : f32 to vector<32x1xf32>
    %165 = arith.cmpf ogt, %163, %164 : vector<32x1xf32>
    %166 = arith.mulf %156, %163 : vector<32x1xf32>
    %cst_54 = arith.constant 0.000000e+00 : f32
    %167 = vector.broadcast %cst_54 : f32 to vector<32x1xf32>
    %168 = arith.select %165, %166, %167 : vector<32x1xi1>, vector<32x1xf32>
    %169 = arith.addf %151, %168 : vector<32x1xf32>
    %170 = vector.extract_strided_slice %7 {offsets = [0, 384], sizes = [32, 128], strides = [1, 1]} : vector<32x640xf32> to vector<32x128xf32>
    %cst_55 = arith.constant 0.000000e+00 : f32
    %171 = vector.broadcast %cst_55 : f32 to vector<32x1xf32>
    %cst_56 = arith.constant 3.000000e+00 : f32
    %172 = vector.broadcast %cst_56 : f32 to vector<32x1xf32>
    %cst_57 = arith.constant dense<0xFF800000> : vector<32xf32>
    %173 = vector.multi_reduction <maximumf>, %170, %cst_57 [1] : vector<32x128xf32> to vector<32xf32>
    %174 = vector.shape_cast %173 : vector<32xf32> to vector<32x1xf32>
    %175 = vector.broadcast %174 : vector<32x1xf32> to vector<32x128xf32>
    %176 = arith.cmpf oeq, %170, %175 : vector<32x128xf32>
    %177 = arith.extui %176 : vector<32x128xi1> to vector<32x128xi32>
    %178 = arith.sitofp %177 : vector<32x128xi32> to vector<32x128xf32>
    %cst_58 = arith.constant dense<0.000000e+00> : vector<32xf32>
    %179 = vector.multi_reduction <add>, %178, %cst_58 [1] : vector<32x128xf32> to vector<32xf32>
    %180 = vector.shape_cast %179 : vector<32xf32> to vector<32x1xf32>
    %181 = arith.minimumf %180, %172 : vector<32x1xf32>
    %cst_59 = arith.constant 0.000000e+00 : f32
    %182 = vector.broadcast %cst_59 : f32 to vector<32x1xf32>
    %183 = arith.cmpf ogt, %181, %182 : vector<32x1xf32>
    %184 = arith.mulf %174, %181 : vector<32x1xf32>
    %cst_60 = arith.constant 0.000000e+00 : f32
    %185 = vector.broadcast %cst_60 : f32 to vector<32x1xf32>
    %186 = arith.select %183, %184, %185 : vector<32x1xi1>, vector<32x1xf32>
    %187 = arith.addf %171, %186 : vector<32x1xf32>
    %188 = arith.subf %172, %181 : vector<32x1xf32>
    %cst_61 = arith.constant 0xFF800000 : f32
    %189 = vector.broadcast %cst_61 : f32 to vector<32x128xf32>
    %190 = arith.select %176, %189, %170 : vector<32x128xi1>, vector<32x128xf32>
    %cst_62 = arith.constant dense<0xFF800000> : vector<32xf32>
    %191 = vector.multi_reduction <maximumf>, %190, %cst_62 [1] : vector<32x128xf32> to vector<32xf32>
    %192 = vector.shape_cast %191 : vector<32xf32> to vector<32x1xf32>
    %193 = vector.broadcast %192 : vector<32x1xf32> to vector<32x128xf32>
    %194 = arith.cmpf oeq, %190, %193 : vector<32x128xf32>
    %195 = arith.extui %194 : vector<32x128xi1> to vector<32x128xi32>
    %196 = arith.sitofp %195 : vector<32x128xi32> to vector<32x128xf32>
    %cst_63 = arith.constant dense<0.000000e+00> : vector<32xf32>
    %197 = vector.multi_reduction <add>, %196, %cst_63 [1] : vector<32x128xf32> to vector<32xf32>
    %198 = vector.shape_cast %197 : vector<32xf32> to vector<32x1xf32>
    %199 = arith.minimumf %198, %188 : vector<32x1xf32>
    %cst_64 = arith.constant 0.000000e+00 : f32
    %200 = vector.broadcast %cst_64 : f32 to vector<32x1xf32>
    %201 = arith.cmpf ogt, %199, %200 : vector<32x1xf32>
    %202 = arith.mulf %192, %199 : vector<32x1xf32>
    %cst_65 = arith.constant 0.000000e+00 : f32
    %203 = vector.broadcast %cst_65 : f32 to vector<32x1xf32>
    %204 = arith.select %201, %202, %203 : vector<32x1xi1>, vector<32x1xf32>
    %205 = arith.addf %187, %204 : vector<32x1xf32>
    %206 = arith.subf %188, %199 : vector<32x1xf32>
    %cst_66 = arith.constant 0xFF800000 : f32
    %207 = vector.broadcast %cst_66 : f32 to vector<32x128xf32>
    %208 = arith.select %194, %207, %190 : vector<32x128xi1>, vector<32x128xf32>
    %cst_67 = arith.constant dense<0xFF800000> : vector<32xf32>
    %209 = vector.multi_reduction <maximumf>, %208, %cst_67 [1] : vector<32x128xf32> to vector<32xf32>
    %210 = vector.shape_cast %209 : vector<32xf32> to vector<32x1xf32>
    %211 = vector.broadcast %210 : vector<32x1xf32> to vector<32x128xf32>
    %212 = arith.cmpf oeq, %208, %211 : vector<32x128xf32>
    %213 = arith.extui %212 : vector<32x128xi1> to vector<32x128xi32>
    %214 = arith.sitofp %213 : vector<32x128xi32> to vector<32x128xf32>
    %cst_68 = arith.constant dense<0.000000e+00> : vector<32xf32>
    %215 = vector.multi_reduction <add>, %214, %cst_68 [1] : vector<32x128xf32> to vector<32xf32>
    %216 = vector.shape_cast %215 : vector<32xf32> to vector<32x1xf32>
    %217 = arith.minimumf %216, %206 : vector<32x1xf32>
    %cst_69 = arith.constant 0.000000e+00 : f32
    %218 = vector.broadcast %cst_69 : f32 to vector<32x1xf32>
    %219 = arith.cmpf ogt, %217, %218 : vector<32x1xf32>
    %220 = arith.mulf %210, %217 : vector<32x1xf32>
    %cst_70 = arith.constant 0.000000e+00 : f32
    %221 = vector.broadcast %cst_70 : f32 to vector<32x1xf32>
    %222 = arith.select %219, %220, %221 : vector<32x1xi1>, vector<32x1xf32>
    %223 = arith.addf %205, %222 : vector<32x1xf32>
    %224 = vector.extract_strided_slice %7 {offsets = [0, 512], sizes = [32, 128], strides = [1, 1]} : vector<32x640xf32> to vector<32x128xf32>
    %cst_71 = arith.constant 0.000000e+00 : f32
    %225 = vector.broadcast %cst_71 : f32 to vector<32x1xf32>
    %cst_72 = arith.constant 3.000000e+00 : f32
    %226 = vector.broadcast %cst_72 : f32 to vector<32x1xf32>
    %cst_73 = arith.constant dense<0xFF800000> : vector<32xf32>
    %227 = vector.multi_reduction <maximumf>, %224, %cst_73 [1] : vector<32x128xf32> to vector<32xf32>
    %228 = vector.shape_cast %227 : vector<32xf32> to vector<32x1xf32>
    %229 = vector.broadcast %228 : vector<32x1xf32> to vector<32x128xf32>
    %230 = arith.cmpf oeq, %224, %229 : vector<32x128xf32>
    %231 = arith.extui %230 : vector<32x128xi1> to vector<32x128xi32>
    %232 = arith.sitofp %231 : vector<32x128xi32> to vector<32x128xf32>
    %cst_74 = arith.constant dense<0.000000e+00> : vector<32xf32>
    %233 = vector.multi_reduction <add>, %232, %cst_74 [1] : vector<32x128xf32> to vector<32xf32>
    %234 = vector.shape_cast %233 : vector<32xf32> to vector<32x1xf32>
    %235 = arith.minimumf %234, %226 : vector<32x1xf32>
    %cst_75 = arith.constant 0.000000e+00 : f32
    %236 = vector.broadcast %cst_75 : f32 to vector<32x1xf32>
    %237 = arith.cmpf ogt, %235, %236 : vector<32x1xf32>
    %238 = arith.mulf %228, %235 : vector<32x1xf32>
    %cst_76 = arith.constant 0.000000e+00 : f32
    %239 = vector.broadcast %cst_76 : f32 to vector<32x1xf32>
    %240 = arith.select %237, %238, %239 : vector<32x1xi1>, vector<32x1xf32>
    %241 = arith.addf %225, %240 : vector<32x1xf32>
    %242 = arith.subf %226, %235 : vector<32x1xf32>
    %cst_77 = arith.constant 0xFF800000 : f32
    %243 = vector.broadcast %cst_77 : f32 to vector<32x128xf32>
    %244 = arith.select %230, %243, %224 : vector<32x128xi1>, vector<32x128xf32>
    %cst_78 = arith.constant dense<0xFF800000> : vector<32xf32>
    %245 = vector.multi_reduction <maximumf>, %244, %cst_78 [1] : vector<32x128xf32> to vector<32xf32>
    %246 = vector.shape_cast %245 : vector<32xf32> to vector<32x1xf32>
    %247 = vector.broadcast %246 : vector<32x1xf32> to vector<32x128xf32>
    %248 = arith.cmpf oeq, %244, %247 : vector<32x128xf32>
    %249 = arith.extui %248 : vector<32x128xi1> to vector<32x128xi32>
    %250 = arith.sitofp %249 : vector<32x128xi32> to vector<32x128xf32>
    %cst_79 = arith.constant dense<0.000000e+00> : vector<32xf32>
    %251 = vector.multi_reduction <add>, %250, %cst_79 [1] : vector<32x128xf32> to vector<32xf32>
    %252 = vector.shape_cast %251 : vector<32xf32> to vector<32x1xf32>
    %253 = arith.minimumf %252, %242 : vector<32x1xf32>
    %cst_80 = arith.constant 0.000000e+00 : f32
    %254 = vector.broadcast %cst_80 : f32 to vector<32x1xf32>
    %255 = arith.cmpf ogt, %253, %254 : vector<32x1xf32>
    %256 = arith.mulf %246, %253 : vector<32x1xf32>
    %cst_81 = arith.constant 0.000000e+00 : f32
    %257 = vector.broadcast %cst_81 : f32 to vector<32x1xf32>
    %258 = arith.select %255, %256, %257 : vector<32x1xi1>, vector<32x1xf32>
    %259 = arith.addf %241, %258 : vector<32x1xf32>
    %260 = arith.subf %242, %253 : vector<32x1xf32>
    %cst_82 = arith.constant 0xFF800000 : f32
    %261 = vector.broadcast %cst_82 : f32 to vector<32x128xf32>
    %262 = arith.select %248, %261, %244 : vector<32x128xi1>, vector<32x128xf32>
    %cst_83 = arith.constant dense<0xFF800000> : vector<32xf32>
    %263 = vector.multi_reduction <maximumf>, %262, %cst_83 [1] : vector<32x128xf32> to vector<32xf32>
    %264 = vector.shape_cast %263 : vector<32xf32> to vector<32x1xf32>
    %265 = vector.broadcast %264 : vector<32x1xf32> to vector<32x128xf32>
    %266 = arith.cmpf oeq, %262, %265 : vector<32x128xf32>
    %267 = arith.extui %266 : vector<32x128xi1> to vector<32x128xi32>
    %268 = arith.sitofp %267 : vector<32x128xi32> to vector<32x128xf32>
    %cst_84 = arith.constant dense<0.000000e+00> : vector<32xf32>
    %269 = vector.multi_reduction <add>, %268, %cst_84 [1] : vector<32x128xf32> to vector<32xf32>
    %270 = vector.shape_cast %269 : vector<32xf32> to vector<32x1xf32>
    %271 = arith.minimumf %270, %260 : vector<32x1xf32>
    %cst_85 = arith.constant 0.000000e+00 : f32
    %272 = vector.broadcast %cst_85 : f32 to vector<32x1xf32>
    %273 = arith.cmpf ogt, %271, %272 : vector<32x1xf32>
    %274 = arith.mulf %264, %271 : vector<32x1xf32>
    %cst_86 = arith.constant 0.000000e+00 : f32
    %275 = vector.broadcast %cst_86 : f32 to vector<32x1xf32>
    %276 = arith.select %273, %274, %275 : vector<32x1xi1>, vector<32x1xf32>
    %277 = arith.addf %259, %276 : vector<32x1xf32>
    %278 = tpu.concatenate %61, %115, %169, %223, %277 in 1 : vector<32x1xf32>, vector<32x1xf32>, vector<32x1xf32>, vector<32x1xf32>, vector<32x1xf32> -> vector<32x5xf32>
    %279 = vector.shape_cast %278 : vector<32x5xf32> to vector<2x16x5xf32>
    %cst_87 = arith.constant dense<0.000000e+00> : vector<2x5xf32>
    %280 = vector.multi_reduction <add>, %279, %cst_87 [1] : vector<2x16x5xf32> to vector<2x5xf32>
    %cst_88 = arith.constant 0.0370370373 : f32
    %281 = vector.broadcast %cst_88 : f32 to vector<2x5xf32>
    %282 = arith.mulf %280, %281 : vector<2x5xf32>
    %283 = vector.shape_cast %282 : vector<2x5xf32> to vector<1x1x2x5xf32>
    %c0_89 = arith.constant 0 : index
    %c0_90 = arith.constant 0 : index
    %c0_91 = arith.constant 0 : index
    %c0_92 = arith.constant 0 : index
    %284 = vector.load %arg5[%c0_89, %c0_90, %c0_91, %c0_92] : memref<1x1x2x5xf32, #tpu.memory_space<vmem>>, vector<1x1x2x5xf32>
    tpu.vector_store %arg5[%c0_89, %c0_90, %c0_91, %c0_92], %283 {strides = array<i32>} : memref<1x1x2x5xf32, #tpu.memory_space<vmem>>, vector<1x1x2x5xf32>,
    return
  }
  func.func @transform_0(%arg0: i32, %arg1: i32) -> (i32, i32, i32) {
    %c0_i32 = arith.constant 0 : i32
    %c0_i32_0 = arith.constant 0 : i32
    return %arg0, %arg1, %c0_i32 : i32, i32, i32
  }
  func.func @transform_1(%arg0: i32, %arg1: i32) -> (i32, i32, i32) {
    %c0_i32 = arith.constant 0 : i32
    %c0_i32_0 = arith.constant 0 : i32
    %c0_i32_1 = arith.constant 0 : i32
    return %arg0, %c0_i32, %c0_i32_0 : i32, i32, i32
  }
  func.func @transform_2(%arg0: i32, %arg1: i32) -> (i32, i32) {
    %c0_i32 = arith.constant 0 : i32
    %c0_i32_0 = arith.constant 0 : i32
    %c0_i32_1 = arith.constant 0 : i32
    return %c0_i32, %c0_i32_0 : i32, i32
  }
  func.func @transform_3(%arg0: i32, %arg1: i32) -> (i32, i32, i32, i32) {
    %c0_i32 = arith.constant 0 : i32
    %c0_i32_0 = arith.constant 0 : i32
    %c0_i32_1 = arith.constant 0 : i32
    return %arg0, %arg1, %c0_i32, %c0_i32_0 : i32, i32, i32, i32
  }
}

</mosaic_0001>

<bundles_post_ra>
// kernel: tpu_custom_call.1
= control target key start
LH: loop header
LB: loop body
LE: loop exit
PB: predicated region body
PF: predicated region fallthrough
CT: control target
= control target key end

     0   :  { %s3083_s0 = inlined_call_operand.hbm [shape: f32[2,64,64], index: 0, kind: input, shape index: {}]   ;;  %s3084_s1 = inlined_call_operand.hbm [shape: f32[2,64,640], index: 1, kind: input, shape index: {}]   ;;  %s3085_s2 = inlined_call_operand.hbm [shape: f32[1,640], index: 2, kind: input, shape index: {}]   ;;  %s3086_s3 = inlined_call_operand.hbm [shape: f32[2,2,2,5], index: 3, kind: output, shape index: {}]  }
   0x1   :  { %3124 = sst [smem:[#allocation51_spill]] %s3085_s2 }
   0x2   :  { %3125 = sst [smem:[#allocation52_spill]] %s3086_s3 }
   0x3   :  { %8 = vsyncpa [#allocation3], 0 }
   0x4   :  { %10 = vsyncpa [#allocation3 + $0x1], 0 }
   0x5   :  { %11 = vsyncpa [#allocation6], 0 }
   0x6   :  { %13 = vsyncpa [#allocation6 + $0x1], 0 }
   0x7   :  { %14 = vsyncpa [#allocation4], 0 }
   0x8   :  { %16 = vsyncpa [#allocation4 + $0x1], 0  ;;  %s1953_s12 = smov 0   ;;  %s1955_s13 = smov 0  }
   0x9   :  { %s1957_s14 = smov 0   ;;  %s1959_s15 = smov 0  }
   0xa   :  { %s1961_s16 = smov 0   ;;  %s1963_s17 = smov 0  }
   0xb   :  { %s1965_s18 = smov 0   ;;  %s1967_s19 = smov 0  }
   0xc   :  { %s1969_s20 = smov 0   ;;  %s1971_s21 = smov 0  }
   0xd   :  { %s1973_s22 = smov 0  }
   0xe LB: > { %3126 = sst [smem:[#allocation13_spill]] %s1897_s15  ;;  %s2007_s23 = sadd.s32 4294967295, %s1925_s22   ;;  %s1925_s22 = sphi %s1973_s22, %s22_s22   ;;  %s1921_s21 = sphi %s1971_s21, %s3238_s21   ;;  %s1917_s20 = sphi %s1969_s20, %s3229_s20   ;;  %s1913_s19 = sphi %s1967_s19, %s3237_s19   ;;  %s1909_s18 = sphi %s1965_s18, %s3228_s18   ;;  %s1905_s17 = sphi %s1963_s17, %s3236_s17   ;;  %s1901_s16 = sphi %s1961_s16, %s3235_s16   ;;  %s1897_s15 = sphi %s1959_s15, %s3234_s15   ;;  %s1893_s14 = sphi %s1957_s14, %s3233_s14   ;;  %s1889_s13 = sphi %s1955_s13, %s3232_s13   ;;  %s1885_s12 = sphi %s1953_s12, %s3231_s12  }
   0xf   : > { %3127 = sst [smem:[#allocation14_spill]] %s1909_s18  ;;  %s1465_s24 = sadd.s32 4294967294, %s1925_s22  }
  0x10   : > { %3128 = sst [smem:[#allocation15_spill]] %s1913_s19  ;;  %p51_p0 = scmp.eq.s32.totalorder %s1925_s22, 0 }
  0x11   : > { %3129 = sst [smem:[#allocation16_spill]] %s1917_s20  ;;  %p56_p1 = scmp.ne.s32.totalorder %s1901_s16, %s1897_s15 }
  0x12   : > { %p57_p2 = scmp.eq.s32.totalorder %s2007_s23, 0  ;;  %p76_p3 = scmp.ne.s32.totalorder %s1893_s14, %s1889_s13 }
  0x13   : > { %p82_p4 = scmp.ne.s32.totalorder %s1889_s13, %s1885_s12  ;;  %p129_p5 = scmp.eq.s32.totalorder %s2007_s23, 3 }
  0x14   : > { %p2020_p6 = por %p57_p2, %p56_p1  ;;  %p2026_p7 = por %p76_p3, %p51_p0 }
  0x15   : > { %p2032_p8 = por %p82_p4, %p57_p2  ;;  %p135_p9 = scmp.eq.s32.totalorder %s1465_s24, 3 }
  0x16   : > { %p1466_p10 = scmp.ge.s32.totalorder %s1925_s22, 1  ;;  %p142_p11 = scmp.lt.s32.totalorder %s1925_s22, 5 }
  0x17   : > { %p2038_p12 = por %p135_p9, %p56_p1  ;;  %s3136_s2 = sld [smem:[#allocation51_spill]] }
  0x18   : > { %p2042_p13 = pnand %p1466_p10, %p142_p11  ;;  %s1927_s6 = smov [#allocation7]  }
  0x19   : > { %s3133_s28 = scalar_select %p2038_p12, 1, 0 }
  0x1a   : > { %p1592_p3 = pneg %p2042_p13  ;;  %s156_s7 = sshll.u32 %s1927_s6, 4  ;;  %s157_s7 = int_to_ptr.vmem [resolvable:$true] %s156_s7 }
  0x1b   : > { %3134 = sst [smem:[#allocation17_spill]] %s3133_s28  ;;  %s31_s8 = sadd.s32 1, %s1917_s20 }
  0x1c   : > { %p1593_p1 = pnand %p1592_p3, %p57_p2  ;;  %s34_s9 = sadd.s32 1, %s1921_s21 }
  0x1d   : > { %s154_s5 = sshll.u32 %s3136_s2, 4  ;;  %p32_p4 = scmp.ge.s32.totalorder %s31_s8, 2  ;;  %s155_s5 = int_to_ptr.hbm [resolvable:$true] %s154_s5 }
  0x1e   : > { %1595 = dma.hbm_to_vmem [thread:$0]  (!%p1593_p1), %s155_s5, 80, %s157_s7, [#allocation6]  }
  0x1f   : > { %s43_s10 = sadd.s32 1, %s1905_s17  ;;  %p50_p9 = scmp.ne.s32.totalorder %s1905_s17, %s1901_s16 }
  0x20   : > { %s69_s11 = sadd.s32 1, %s1893_s14  ;;  %s3240_s8 = smov (%p32_p4, %s31_s8), 0 }
  0x21   : > { %3137 = sst [smem:[#allocation18_spill]] %s3240_s8  ;;  %s3242_s9 = smov (!%p32_p4, %s34_s9), %s1921_s21 }
  0x22   : > { %s39_s12 = ssub.s32 %s1917_s20, %s3240_s8  ;;  %p2066_p10 = por %p51_p0, %p50_p9 }
  0x23   : > { %p36_p11 = scmp.ge.s32.totalorder %s3242_s9, 2  ;;  %p2072_p3 = por %p129_p5, %p50_p9 }
  0x24   : > { %p1608_p1 = scmp.lt.s32.totalorder %s1925_s22, 4  ;;  %s167_s4 = sand.u32 1, %s1905_s17  }
  0x25   : > { %s3139_s30 = scalar_select %p2072_p3, 1, 0 }
  0x26   : > { %s3244_s9 = smov (%p36_p11, %s3242_s9), 0  ;;  %s1469_s5 = sshll.u32 %s167_s4, 5 }
  0x27   : > { %3140 = sst [smem:[#allocation19_spill]] %s3139_s30  ;;  %s38_s6 = ssub.s32 %s1921_s21, %s3244_s9 }
  0x28   : > { %3141 = sst [smem:[#allocation20_spill]] %s3244_s9  ;;  %s40_s7 = sor.u32 %s39_s12, %s38_s6 }
  0x29   : > { %p67_p0 = scmp.eq.s32.totalorder %s38_s6, 0  ;;  %p41_p4 = scmp.eq.s32.totalorder %s40_s7, 0 }
  0x2a   : > { %s1470_s2 = sshll.u32 %s1917_s20, 2  ;;  %s1471_s15 = sshll.u32 %s1921_s21, 3 }
  0x2b   : > { %s2084_s8 = scalar_select %p67_p0, %s1893_s14, %s69_s11  }
  0x2c   : > { %s2087_s28 = scalar_select %p41_p4, %s1905_s17, %s43_s10  }
  0x2d   : > { %s171_s30 = scalar_lea.vmem [#allocation2], %s1469_s5  ;;  %s176_s18 = sadd.s32 %s1471_s15, %s1470_s2 }
  0x2e   : > { %s181_s3 = sshll.u32 %s171_s30, 4  ;;  %s1472_s19 = sshll.u32 %s176_s18, 3  ;;  %s182_s3 = int_to_ptr.vmem [resolvable:$true] %s181_s3 }
  0x2f   : > { %p1597_p5 = pnand %p1608_p1, %p2066_p10  ;;  %s178_s11 = scalar_lea.hbm %s3083_s0, %s1472_s19 }
  0x30   : > { %s179_s7 = sshll.u32 %s178_s11, 4  ;;  %s168_s10 = scalar_lea.sflag [#allocation3], %s167_s4  ;;  %s180_s7 = int_to_ptr.hbm [resolvable:$true] %s179_s7 }
  0x31   : > { %s1928_s9 = smov 128   ;;  %s1929_s20 = smov 8  }
  0x32   : > { %1599 = dma.hbm_to_vmem [thread:$0]  (!%p1597_p5), %s180_s7, 512, %s182_s3, %s168_s10, %s1928_s9, %s1928_s9, %s1929_s20  }
  0x33   : > { %p2101_p9 = pnand %p1608_p1, %p2026_p7  ;;  %s191_s2 = sand.u32 1, %s1925_s22  }
  0x34   : > { %s193_s15 = sand.u32 1, %s1893_s14   ;;  %s1580_s24 = smul.u32 320, %s1921_s21 }
  0x35   : > { %s1579_s18 = smul.u32 320, %s193_s15  ;;  %s192_s3 = scalar_lea.sflag [#allocation6], %s191_s2 }
  0x36   : > { %s200_s19 = scalar_lea.hbm %s3084_s1, %s1580_s24  ;;  %s1930_s20 = smov 640  }
  0x37   : > { %s195_s6 = scalar_lea.vmem [#allocation5], %s1579_s18  ;;  %s201_s11 = sshll.u32 %s200_s19, 4  ;;  %s202_s11 = int_to_ptr.hbm [resolvable:$true] %s201_s11 }
  0x38   : > { %s203_s4 = sshll.u32 %s195_s6, 4  ;;  %s1931_s26 = smov 40   ;;  %s204_s4 = int_to_ptr.vmem [resolvable:$true] %s203_s4 }
  0x39   : > { %1602 = dma.hbm_to_vmem [thread:$0]  (!%p2101_p9), %s202_s11, 5120, %s204_s4, %s192_s3, %s1930_s20, %s1930_s20, %s1931_s26  }
  0x3a   : > { %215 = sbr.rel (%p2042_p13) target bundleno = 855 (0x357), region = 32 }
  0x3f   : > { %s2116_s9 = sand.u32 1, %s1901_s16  }
  0x40   : > { %s1475_s7 = sshll.u32 %s2116_s9, 5  ;;  %s218_s10 = scalar_lea.sflag [#allocation3], %s2116_s9 }
  0x41   : > { %s2120_s15 = scalar_lea.vmem [#allocation2], %s1475_s7 }
  0x42   : > { %1868 = dma.done.wait (%p2020_p6), %s218_s10, 512  }
  0x43   : > { %1870 = vsyncadd (%p2020_p6), %s218_s10, 4294966784  ;;  %s227_s29 = sand.u32 1, %s2007_s23   ;;  %s229_s30 = sand.u32 1, %s1889_s13  }
  0x44   : > { %s1581_s2 = smul.u32 320, %s229_s30  ;;  %s228_s18 = scalar_lea.sflag [#allocation6], %s227_s29 }
  0x46   : > { %s2128_s24 = scalar_lea.vmem [#allocation5], %s1581_s2 }
  0x47   : > { %1872 = dma.done.wait (%p2032_p8), %s228_s18, 5120  }
  0x48   : > { %1874 = vsyncadd (%p2032_p8), %s228_s18, 4294962176 }
  0x49   : > { %1876 = dma.done.wait (%p57_p2), [#allocation6], 80  }
  0x4a   : > { %1878 = vsyncadd (%p57_p2), [#allocation6], 4294967216  ;;  %v305_v0 = vld [vmem:[%s2128_s24 + $0x118] sm:$0xff]  ;;  %v307_v1 = vld [vmem:[%s2128_s24 + $0x128] sm:$0xff]  ;;  %vm322_vm0 = vcmask 523264   ;;  %s3222_s23 = sld [smem:[#allocation15_spill]] }
  0x4b   : > { %v308_v2 = vld [vmem:[%s2128_s24 + $0x130] sm:$0xff]  ;;  %343 = vmatpush.msra.mxu0 %v305_v0  ;;  %1563 = vmatpush.msra.mxu1 %v305_v0  ;;  %v302_v4 = vld [vmem:[%s2128_s24 + $0x100] sm:$0xff]  ;;  %v303_v5 = vld [vmem:[%s2128_s24 + $0x108] sm:$0xff]  ;;  %s3223_s25 = sld [smem:[#allocation14_spill]]  ;;  %s1477_s12 = sshll.u32 %s2116_s9, 1 }
  0x4c   : > { %v300_v3 = vld [vmem:[%s2128_s24 + $0xf0] sm:$0xff]  ;;  %401 = vmatpush.msra.mxu2 %v307_v1  ;;  %430 = vmatpush.msra.mxu3 %v308_v2  ;;  %v295_v6 = vld [vmem:[%s2128_s24 + $0xc8] sm:$0xff]  ;;  %v297_v7 = vld [vmem:[%s2128_s24 + $0xd8] sm:$0xff]  ;;  %s3224_s11 = sld [smem:[#allocation52_spill]]  ;;  %s264_s20 = scalar_lea.vmem [#allocation8], %s1477_s12 }
  0x4d   : > { %344 = vmatpush.msra.mxu0 %v300_v3  ;;  %1564 = vmatpush.msra.mxu1 %v300_v3  ;;  %v298_v8 = vld [vmem:[%s2128_s24 + $0xe0] sm:$0xff]  ;;  %v292_v10 = vld [vmem:[%s2128_s24 + $0xb0] sm:$0xff]  ;;  %v293_v11 = vld [vmem:[%s2128_s24 + $0xb8] sm:$0xff]  ;;  %s1343_s7 = sshll.u32 %s264_s20, 4  ;;  %s1344_s7 = int_to_ptr.vmem [resolvable:$true] %s1343_s7 }
  0x4e   : > { %402 = vmatpush.msra.mxu2 %v302_v4  ;;  %431 = vmatpush.msra.mxu3 %v303_v5  ;;  %v290_v9 = vld [vmem:[%s2128_s24 + $0xa0] sm:$0xff]  ;;  %v285_v12 = vld [vmem:[%s2128_s24 + $0x78] sm:$0xff]  ;;  %v287_v13 = vld [vmem:[%s2128_s24 + $0x88] sm:$0xff] }
  0x4f   : > { %345 = vmatpush.msra.mxu0 %v295_v6  ;;  %1565 = vmatpush.msra.mxu1 %v295_v6  ;;  %v288_v14 = vld [vmem:[%s2128_s24 + $0x90] sm:$0xff]  ;;  %v282_v16 = vld [vmem:[%s2128_s24 + $0x60] sm:$0xff]  ;;  %v283_v17 = vld [vmem:[%s2128_s24 + $0x68] sm:$0xff] }
  0x50   : > { %403 = vmatpush.msra.mxu2 %v297_v7  ;;  %432 = vmatpush.msra.mxu3 %v298_v8  ;;  %v280_v15 = vld [vmem:[%s2128_s24 + $0x50] sm:$0xff]  ;;  %v275_v18 = vld [vmem:[%s2128_s24 + $0x28] sm:$0xff]  ;;  %v277_v19 = vld [vmem:[%s2128_s24 + $0x38] sm:$0xff]  ;;  %s1559_s27 = sshll.u32 %s3222_s23, 1 }
  0x51   : > { %346 = vmatpush.msra.mxu0 %v290_v9  ;;  %1566 = vmatpush.msra.mxu1 %v290_v9  ;;  %v278_v20 = vld [vmem:[%s2128_s24 + $0x40] sm:$0xff]  ;;  %v272_v22 = vld [vmem:[%s2128_s24 + $0x10] sm:$0xff]  ;;  %v273_v23 = vld [vmem:[%s2128_s24 + $0x18] sm:$0xff]  ;;  %s1339_s5 = sadd.s32 %s3223_s25, %s1559_s27 }
  0x52   : > { %404 = vmatpush.msra.mxu2 %v292_v10  ;;  %433 = vmatpush.msra.mxu3 %v293_v11  ;;  %v270_v21 = vld [vmem:[%s2128_s24] sm:$0xff]  ;;  %v2164_v25 = vld [vmem:[%s2120_s15 + $0x10] sm:$0xff]  ;;  %v309_v27 = vld [vmem:[%s2128_s24 + $0x138] sm:$0xff]  ;;  %s1560_s19 = sshll.u32 %s1339_s5, 1 }
  0x53   : > { %347 = vmatpush.msra.mxu0 %v285_v12  ;;  %1567 = vmatpush.msra.mxu1 %v285_v12  ;;  %v266_v24 = vld [vmem:[%s2120_s15] sm:$0xff]  ;;  %v301_v28 = vld [vmem:[%s2128_s24 + $0xf8] sm:$0xff]  ;;  %v304_v29 = vld [vmem:[%s2128_s24 + $0x110] sm:$0xff]  ;;  %s1341_s3 = scalar_lea.hbm %s3224_s11, %s1560_s19 }
  0x54   : > { %405 = vmatpush.msra.mxu2 %v287_v13  ;;  %434 = vmatpush.msra.mxu3 %v288_v14  ;;  %v306_v26 = vld [vmem:[%s2128_s24 + $0x120] sm:$0xff]  ;;  %v296_v30 = vld [vmem:[%s2128_s24 + $0xd0] sm:$0xff]  ;;  %v299_v31 = vld [vmem:[%s2128_s24 + $0xe8] sm:$0xff]  ;;  %s1345_s10 = sshll.u32 %s1341_s3, 4  ;;  %s1346_s10 = int_to_ptr.hbm [resolvable:$true] %s1345_s10 }
  0x55   : > { %348 = vmatpush.msra.mxu0 %v280_v15  ;;  %1568 = vmatpush.msra.mxu1 %v280_v15  ;;  %v269_v32 = vld [vmem:[%s2120_s15 + $0x18] sm:$0xff]  ;;  %v267_v33 = vld [vmem:[%s2120_s15 + $0x8] sm:$0xff]  ;;  %v294_v35 = vld [vmem:[%s2128_s24 + $0xc0] sm:$0xff]  ;;  %s1329_s15 = scalar_lea.sflag [#allocation4], %s2116_s9  ;;  %s1809_s29 = sshra.s32 %s1346_s10, 4  ;;  %s1810_s29 = int_to_ptr.hbm [resolvable:$true] %s1809_s29 }
  0x56   : > { %406 = vmatpush.msra.mxu2 %v282_v16  ;;  %435 = vmatpush.msra.mxu3 %v283_v17  ;;  %v291_v34 = vld [vmem:[%s2128_s24 + $0xa8] sm:$0xff]  ;;  %v286_v36 = vld [vmem:[%s2128_s24 + $0x80] sm:$0xff]  ;;  %v289_v37 = vld [vmem:[%s2128_s24 + $0x98] sm:$0xff]  ;;  %s1811_s30 = scalar_lea.hbm %s1810_s29, 2  ;;  %p1816_p8 = scmp.lt.s32.totalorder %s1810_s29, %s3224_s11 }
  0x57   : > { %349 = vmatpush.msra.mxu0 %v275_v18  ;;  %1569 = vmatpush.msra.mxu1 %v275_v18  ;;  %v281_v38 = vld [vmem:[%s2128_s24 + $0x58] sm:$0xff]  ;;  %v284_v39 = vld [vmem:[%s2128_s24 + $0x70] sm:$0xff]  ;;  %v279_v41 = vld [vmem:[%s2128_s24 + $0x48] sm:$0xff]  ;;  %p1812_p2 = scmp.ne.s32.totalorder %s1810_s29, %s1811_s30 }
  0x58   : > { %407 = vmatpush.msra.mxu2 %v277_v19  ;;  %436 = vmatpush.msra.mxu3 %v278_v20  ;;  %v276_v40 = vld [vmem:[%s2128_s24 + $0x30] sm:$0xff]  ;;  %v271_v42 = vld [vmem:[%s2128_s24 + $0x8] sm:$0xff]  ;;  %v274_v43 = vld [vmem:[%s2128_s24 + $0x20] sm:$0xff]  ;;  %s1815_s24 = scalar_lea.hbm %s3224_s11, 8 }
  0x59   : > { %350 = vmatpush.msra.mxu0 %v270_v21  ;;  %1570 = vmatpush.msra.mxu1 %v270_v21  ;;  %v310_v44 = vld [vmem:[#allocation7] sm:$0x1f]  ;;  %p1813_p6 = pnand %p1812_p2, %p2072_p3  ;;  %p1817_p13 = scmp.lt.s32.totalorder %s1815_s24, %s1811_s30 }
  0x5a   : > { %408 = vmatpush.msra.mxu2 %v272_v22  ;;  %437 = vmatpush.msra.mxu3 %v273_v23  ;;  %v312_v45 = vperm.slane %v310_v44, 0  ;;  %v314_v50 = vperm.slane %v310_v44, 2  ;;  %v315_v51 = vperm.slane %v310_v44, 3  ;;  %v313_v6 = vperm.slane %v310_v44, 1 }
  0x5b   : > { %1478 = vmatmul.msk.f32.vlgmr.msra.gmra.mxu0 %vm322_vm0, %v266_v24  ;;  %1480 = vmatmul.msk.f32.vlgmr.msra.gmra.mxu1 %vm322_vm0, %v2164_v25  ;;  %v316_v13 = vperm.slane %v310_v44, 4  ;;  %p1814_p7 = pneg %p1813_p6  ;;  %p1818_p10 = por %p1817_p13, %p1816_p8 }
  0x5c   : > { %1486 = vmatmul.msk.f32.vlgmr.msra.gmra.mxu2 %vm322_vm0, %v266_v24  ;;  %1490 = vmatmul.msk.f32.vlgmr.msra.gmra.mxu3 %vm322_vm0, %v266_v24 }
  0x5d   : > { %372 = vmatpush.msrb.mxu1 %v306_v26  ;;  %459 = vmatpush.msrb.mxu0 %v309_v27  ;;  %p1819_p11 = pnand %p1818_p10, %p1814_p7 }
  0x5e   : > { %1571 = vmatpush.msrb.mxu2 %v309_v27 }
  0x5f   : > { %373 = vmatpush.msrb.mxu1 %v301_v28  ;;  %460 = vmatpush.msrb.mxu0 %v304_v29 }
  0x60   : > { %1572 = vmatpush.msrb.mxu2 %v304_v29  ;;  %v3116_v29 = vmov 0.0  }
  0x61   : > { %374 = vmatpush.msrb.mxu1 %v296_v30  ;;  %461 = vmatpush.msrb.mxu0 %v299_v31 }
  0x62   : > { %1573 = vmatpush.msrb.mxu2 %v299_v31 }
  0x63   : > { %1481 = vmatmul.msk.f32.gmra.mxu1 %vm322_vm0, %v269_v32  ;;  %1479 = vmatmul.msk.f32.gmra.mxu0 %vm322_vm0, %v267_v33 }
  0x64   : > { %1487 = vmatmul.msk.f32.gmra.mxu2 %vm322_vm0, %v267_v33  ;;  %1491 = vmatmul.msk.f32.gmra.mxu3 %vm322_vm0, %v267_v33 }
  0x65   : > { %375 = vmatpush.msrb.mxu1 %v291_v34  ;;  %462 = vmatpush.msrb.mxu0 %v294_v35 }
  0x66   : > { %1574 = vmatpush.msrb.mxu2 %v294_v35 }
  0x67   : > { %376 = vmatpush.msrb.mxu1 %v286_v36  ;;  %463 = vmatpush.msrb.mxu0 %v289_v37 }
  0x68   : > { %1575 = vmatpush.msrb.mxu2 %v289_v37 }
  0x69   : > { %377 = vmatpush.msrb.mxu1 %v281_v38  ;;  %464 = vmatpush.msrb.mxu0 %v284_v39 }
  0x6a   : > { %1576 = vmatpush.msrb.mxu2 %v284_v39 }
  0x6b   : > { %378 = vmatpush.msrb.mxu1 %v276_v40  ;;  %465 = vmatpush.msrb.mxu0 %v279_v41 }
  0x6c   : > { %1488 = vmatmul.msk.f32.gmra.mxu2 %vm322_vm0, %v2164_v25  ;;  %1492 = vmatmul.msk.f32.gmra.mxu3 %vm322_vm0, %v2164_v25 }
  0x6d   : > { %379 = vmatpush.msrb.mxu1 %v271_v42  ;;  %466 = vmatpush.msrb.mxu0 %v274_v43 }
  0x6e   : > { %1482 = vmatmul.msk.f32.vlgmr.msrb.gmra.mxu1 %vm322_vm0, %v266_v24  ;;  %1494 = vmatmul.msk.f32.vlgmr.msrb.gmra.mxu0 %vm322_vm0, %v266_v24 }
  0x6f   : > { %1577 = vmatpush.msrb.mxu2 %v279_v41 }
  0x71   : > { %1578 = vmatpush.msrb.mxu2 %v274_v43 }
  0x74   : > { %1493 = vmatmul.msk.f32.gmra.mxu3 %vm322_vm0, %v269_v32  ;;  %1489 = vmatmul.msk.f32.gmra.mxu2 %vm322_vm0, %v269_v32 }
  0x76   : > { %1483 = vmatmul.msk.f32.gmra.mxu1 %vm322_vm0, %v267_v33  ;;  %1495 = vmatmul.msk.f32.gmra.mxu0 %vm322_vm0, %v267_v33 }
  0x7c   : > { %1497 = vmatmul.msk.f32.vlgmr.msrb.gmra.mxu2 %vm322_vm0, %v269_v32 }
  0x7e   : > { %1484 = vmatmul.msk.f32.gmra.mxu1 %vm322_vm0, %v2164_v25  ;;  %1496 = vmatmul.msk.f32.gmra.mxu0 %vm322_vm0, %v2164_v25 }
  0x86   : > { %1485 = vmatmul.msk.f32.gmra.mxu1 %vm322_vm0, %v269_v32 }
  0xd8   : > { %v352_v46 = vpop.f32.mrf.mxu0  ;;  %v358_v47 = vpop.f32.mrf.mxu1 }
  0xd9   : > { %v2209_v48 = vadd.f32 %v352_v46, %v312_v45  ;;  %v2211_v49 = vadd.f32 %v358_v47, %v312_v45 }
  0xdb   : > { %484 = vmax.xlane.f32.xlu1 %v2211_v49  ;;  %480 = vmax.xlane.f32.xlu0 %v2209_v48 }
  0xdf   : > { %v410_v52 = vpop.f32.mrf.mxu2  ;;  %v439_v53 = vpop.f32.mrf.mxu3 }
  0xe0   : > { %v2215_v54 = vadd.f32 %v410_v52, %v314_v50  ;;  %v2217_v55 = vadd.f32 %v439_v53, %v315_v51  ;;  %v361_v56 = vpop.f32.mrf.mxu1  ;;  %v355_v58 = vpop.f32.mrf.mxu0 }
  0xe1   : > { %v2219_v57 = vadd.f32 %v361_v56, %v312_v45  ;;  %v2224_v61 = vadd.f32 %v355_v58, %v312_v45 }
  0xe2   : > { %960 = vmax.xlane.f32.xlu2 %v2217_v55 }
  0xe3   : > { %486 = vmax.xlane.f32.xlu1 %v2219_v57  ;;  %800 = vmax.xlane.f32.xlu0 %v2215_v54 }
  0xe7   : > { %v413_v59 = vpop.f32.mrf.mxu2  ;;  %v442_v60 = vpop.f32.mrf.mxu3 }
  0xe8   : > { %v2226_v62 = vadd.f32 %v413_v59, %v314_v50  ;;  %v2230_v1 = vadd.f32 %v442_v60, %v315_v51 }
  0xeb   : > { %802 = vmax.xlane.f32.xlu1 %v2226_v62  ;;  %482 = vmax.xlane.f32.xlu0 %v2224_v61  ;;  %v381_v63 = vpop.f32.mrf.mxu1  ;;  %v468_v0 = vpop.f32.mrf.mxu0 }
  0xec   : > { %v2239_v8 = vadd.f32 %v381_v63, %v313_v6  ;;  %v2250_v16 = vadd.f32 %v468_v0, %v316_v13 }
  0xef   : > { %v416_v2 = vpop.f32.mrf.mxu2  ;;  %v445_v3 = vpop.f32.mrf.mxu3 }
  0xf0   : > { %v2232_v4 = vadd.f32 %v416_v2, %v314_v50  ;;  %v2234_v5 = vadd.f32 %v445_v3, %v315_v51 }
  0xf2   : > { %804 = vmax.xlane.f32.xlu2 %v2232_v4 }
  0xf3   : > { %964 = vmax.xlane.f32.xlu1 %v2234_v5  ;;  %962 = vmax.xlane.f32.xlu0 %v2230_v1  ;;  %v384_v7 = vpop.f32.mrf.mxu1  ;;  %v471_v12 = vpop.f32.mrf.mxu0 }
  0xf4   : > { %v2241_v9 = vadd.f32 %v384_v7, %v313_v6  ;;  %v2252_v17 = vadd.f32 %v471_v12, %v316_v13 }
  0xf7   : > { %v448_v10 = vpop.f32.mrf.mxu3  ;;  %v419_v18 = vpop.f32.mrf.mxu2 }
  0xf8   : > { %v2243_v11 = vadd.f32 %v448_v10, %v315_v51  ;;  %v2259_v21 = vadd.f32 %v419_v18, %v314_v50 }
  0xfa   : > { %966 = vmax.xlane.f32.xlu2 %v2243_v11 }
  0xfb   : > { %642 = vmax.xlane.f32.xlu1 %v2241_v9  ;;  %640 = vmax.xlane.f32.xlu0 %v2239_v8  ;;  %v387_v14 = vpop.f32.mrf.mxu1  ;;  %v474_v19 = vpop.f32.mrf.mxu0 }
  0xfc   : > { %v2248_v15 = vadd.f32 %v387_v14, %v313_v6  ;;  %v2257_v20 = vadd.f32 %v474_v19, %v316_v13 }
  0xff   : > { %v477_v22 = vpop.f32.mrf.mxu2 }
 0x100   : > { %v2263_v23 = vadd.f32 %v477_v22, %v316_v13 }
 0x102   : > { %644 = vmax.xlane.f32.xlu2 %v2248_v15 }
 0x103   : > { %1122 = vmax.xlane.f32.xlu1 %v2252_v17  ;;  %1120 = vmax.xlane.f32.xlu0 %v2250_v16  ;;  %v390_v24 = vpop.f32.mrf.mxu1 }
 0x104   : > { %v2266_v25 = vadd.f32 %v390_v24, %v313_v6 }
 0x10a   : > { %1124 = vmax.xlane.f32.xlu2 %v2257_v20 }
 0x10b   : > { %806 = vmax.xlane.f32.xlu0 %v2259_v21 }
 0x113   : > { %1126 = vmax.xlane.f32.xlu0 %v2263_v23 }
 0x11b   : > { %646 = vmax.xlane.f32.xlu0 %v2266_v25 }
 0x14e   : > { %v2269_v26 = vpop.xlane.xlu1 %484  ;;  %v2271_v27 = vpop.xlane.xlu0 %480 }
 0x14f   : > { %vm490_vm1 = vcmp.eq.f32.partialorder %v2211_v49, %v2269_v26  ;;  %vm488_vm2 = vcmp.eq.f32.partialorder %v2209_v48, %v2271_v27 }
 0x150   : > { %v2278_v28 = vsel %vm490_vm1, -inf, %v2211_v49  ;;  %v1500_v30 = vsel %vm490_vm1, 1.0, %v3116_v29  ;;  %v1498_v31 = vsel %vm488_vm2, 1.0, %v3116_v29  ;;  %v2289_v34 = vsel %vm488_vm2, -inf, %v2209_v48 }
 0x151   : > { %540 = vmax.xlane.f32.xlu1 %v2278_v28  ;;  %504 = vadd.xlane.f32.xlu0 %v1500_v30 }
 0x152   : > { %500 = vadd.xlane.f32.xlu2 %v1498_v31 }
 0x155   : > { %v2294_v36 = vpop.xlane.xlu2 %960 }
 0x156   : > { %v2283_v32 = vpop.xlane.xlu0 %800  ;;  %v2291_v35 = vpop.xlane.xlu1 %486  ;;  %vm968_vm4 = vcmp.eq.f32.partialorder %v2217_v55, %v2294_v36 }
 0x157   : > { %vm808_vm3 = vcmp.eq.f32.partialorder %v2215_v54, %v2283_v32  ;;  %v1534_v40 = vsel %vm968_vm4, 1.0, %v3116_v29  ;;  %v2318_v43 = vsel %vm968_vm4, -inf, %v2217_v55  ;;  %vm491_vm7 = vcmp.eq.f32.partialorder %v2219_v57, %v2291_v35 }
 0x158   : > { %v1522_v33 = vsel %vm808_vm3, 1.0, %v3116_v29  ;;  %v2303_v38 = vsel %vm808_vm3, -inf, %v2215_v54  ;;  %v1501_v48 = vsel %vm491_vm7, 1.0, %v3116_v29  ;;  %v2334_v49 = vsel %vm491_vm7, -inf, %v2219_v57 }
 0x159   : > { %820 = vadd.xlane.f32.xlu1 %v1522_v33 }
 0x15a   : > { %536 = vmax.xlane.f32.xlu2 %v2289_v34 }
 0x15e   : > { %v2296_v37 = vpop.xlane.xlu0 %482  ;;  %v2311_v41 = vpop.xlane.xlu1 %802 }
 0x15f   : > { %vm489_vm5 = vcmp.eq.f32.partialorder %v2224_v61, %v2296_v37  ;;  %vm809_vm9 = vcmp.eq.f32.partialorder %v2226_v62, %v2311_v41 }
 0x160   : > { %v2306_v39 = vsel %vm489_vm5, -inf, %v2224_v61  ;;  %v1499_v45 = vsel %vm489_vm5, 1.0, %v3116_v29  ;;  %v1523_v54 = vsel %vm809_vm9, 1.0, %v3116_v29  ;;  %v2368_v58 = vsel %vm809_vm9, -inf, %v2226_v62 }
 0x161   : > { %856 = vmax.xlane.f32.xlu1 %v2303_v38  ;;  %538 = vmax.xlane.f32.xlu0 %v2306_v39 }
 0x162   : > { %980 = vadd.xlane.f32.xlu2 %v1534_v40 }
 0x165   : > { %v2356_v55 = vpop.xlane.xlu2 %804 }
 0x166   : > { %v2313_v42 = vpop.xlane.xlu0 %962  ;;  %v2328_v46 = vpop.xlane.xlu1 %964  ;;  %vm810_vm12 = vcmp.eq.f32.partialorder %v2232_v4, %v2356_v55 }
 0x167   : > { %vm969_vm6 = vcmp.eq.f32.partialorder %v2230_v1, %v2313_v42  ;;  %vm970_vm11 = vcmp.eq.f32.partialorder %v2234_v5, %v2328_v46  ;;  %v1524_v57 = vsel %vm810_vm12, 1.0, %v3116_v29  ;;  %v2380_v61 = vsel %vm810_vm12, -inf, %v2232_v4 }
 0x168   : > { %v1535_v44 = vsel %vm969_vm6, 1.0, %v3116_v29  ;;  %v1536_v56 = vsel %vm970_vm11, 1.0, %v3116_v29  ;;  %v2386_v62 = vsel %vm969_vm6, -inf, %v2230_v1  ;;  %v2398_v0 = vsel %vm970_vm11, -inf, %v2234_v5 }
 0x169   : > { %1016 = vmax.xlane.f32.xlu1 %v2318_v43  ;;  %982 = vadd.xlane.f32.xlu0 %v1535_v44 }
 0x16a   : > { %502 = vadd.xlane.f32.xlu2 %v1499_v45 }
 0x16d   : > { %v2411_v3 = vpop.xlane.xlu2 %966 }
 0x16e   : > { %v2330_v47 = vpop.xlane.xlu0 %640  ;;  %v2345_v51 = vpop.xlane.xlu1 %642  ;;  %3146 = vst [vmem:[#allocation24_spill] sm:$0xff] %v2411_v3  ;;  %vm971_vm0 = vcmp.eq.f32.partialorder %v2243_v11, %v2411_v3 }
 0x16f   : > { %vm648_vm8 = vcmp.eq.f32.partialorder %v2239_v8, %v2330_v47  ;;  %3143 = vst [vmem:[#allocation21_spill] sm:$0xff] %v2345_v51  ;;  %vm649_vm15 = vcmp.eq.f32.partialorder %v2241_v9, %v2345_v51 }
 0x170   : > { %v1510_v52 = vsel %vm648_vm8, 1.0, %v3116_v29  ;;  %v2405_v1 = vsel %vm648_vm8, -inf, %v2239_v8  ;;  %v2414_v4 = vsel %vm649_vm15, -inf, %v2241_v9  ;;  %v2439_v9 = vsel %vm971_vm0, -inf, %v2243_v11 }
 0x171   : > { %506 = vadd.xlane.f32.xlu1 %v1501_v48  ;;  %v1511_v10 = vsel %vm649_vm15, 1.0, %v3116_v29  ;;  %v1537_v11 = vsel %vm971_vm0, 1.0, %v3116_v29 }
 0x172   : > { %542 = vmax.xlane.f32.xlu2 %v2334_v49 }
 0x175   : > { %v2430_v7 = vpop.xlane.xlu2 %644 }
 0x176   : > { %v2339_v50 = vpop.xlane.xlu0 %1120  ;;  %v2370_v59 = vpop.xlane.xlu1 %1122  ;;  %3147 = vst [vmem:[#allocation25_spill] sm:$0xff] %v2430_v7  ;;  %vm650_vm1 = vcmp.eq.f32.partialorder %v2248_v15, %v2430_v7 }
 0x177   : > { %vm1128_vm10 = vcmp.eq.f32.partialorder %v2250_v16, %v2339_v50  ;;  %3144 = vst [vmem:[#allocation22_spill] sm:$0xff] %v2370_v59  ;;  %vm1129_vm13 = vcmp.eq.f32.partialorder %v2252_v17, %v2370_v59  ;;  %v1512_v13 = vsel %vm650_vm1, 1.0, %v3116_v29  ;;  %v2450_v14 = vsel %vm650_vm1, -inf, %v2248_v15 }
 0x178   : > { %v1546_v53 = vsel %vm1128_vm10, 1.0, %v3116_v29  ;;  %v1547_v60 = vsel %vm1129_vm13, 1.0, %v3116_v29  ;;  %v2423_v6 = vsel %vm1128_vm10, -inf, %v2250_v16  ;;  %v2436_v8 = vsel %vm1129_vm13, -inf, %v2252_v17 }
 0x179   : > { %660 = vadd.xlane.f32.xlu1 %v1510_v52  ;;  %1140 = vadd.xlane.f32.xlu0 %v1546_v53 }
 0x17a   : > { %822 = vadd.xlane.f32.xlu2 %v1523_v54 }
 0x17d   : > { %v2454_v16 = vpop.xlane.xlu2 %1124 }
 0x17e   : > { %v2389_v63 = vpop.xlane.xlu0 %806  ;;  %3149 = vst [vmem:[#allocation27_spill] sm:$0xff] %v2454_v16  ;;  %vm1130_vm2 = vcmp.eq.f32.partialorder %v2257_v20, %v2454_v16 }
 0x17f   : > { %3145 = vst [vmem:[#allocation23_spill] sm:$0xff] %v2389_v63  ;;  %vm811_vm14 = vcmp.eq.f32.partialorder %v2259_v21, %v2389_v63  ;;  %v2461_v17 = vsel %vm1130_vm2, -inf, %v2257_v20  ;;  %v1548_v18 = vsel %vm1130_vm2, 1.0, %v3116_v29 }
 0x180   : > { %v1525_v2 = vsel %vm811_vm14, 1.0, %v3116_v29  ;;  %v2417_v5 = vsel %vm811_vm14, -inf, %v2259_v21 }
 0x181   : > { %984 = vadd.xlane.f32.xlu1 %v1536_v56  ;;  %824 = vadd.xlane.f32.xlu0 %v1524_v57 }
 0x182   : > { %858 = vmax.xlane.f32.xlu2 %v2368_v58 }
 0x186   : > { %v2446_v12 = vpop.xlane.xlu0 %1126 }
 0x187   : > { %3148 = vst [vmem:[#allocation26_spill] sm:$0xff] %v2446_v12  ;;  %vm1131_vm3 = vcmp.eq.f32.partialorder %v2263_v23, %v2446_v12 }
 0x188   : > { %v1549_v15 = vsel %vm1131_vm3, 1.0, %v3116_v29  ;;  %v2472_v22 = vsel %vm1131_vm3, -inf, %v2263_v23 }
 0x189   : > { %1142 = vadd.xlane.f32.xlu1 %v1547_v60  ;;  %860 = vmax.xlane.f32.xlu0 %v2380_v61 }
 0x18a   : > { %1018 = vmax.xlane.f32.xlu2 %v2386_v62 }
 0x18e   : > { %v2466_v19 = vpop.xlane.xlu0 %646 }
 0x18f   : > { %3150 = vst [vmem:[#allocation28_spill] sm:$0xff] %v2466_v19  ;;  %vm651_vm4 = vcmp.eq.f32.partialorder %v2266_v25, %v2466_v19 }
 0x190   : > { %v1513_v21 = vsel %vm651_vm4, 1.0, %v3116_v29  ;;  %v2476_v20 = vsel %vm651_vm4, -inf, %v2266_v25 }
 0x191   : > { %1020 = vmax.xlane.f32.xlu0 %v2398_v0  ;;  %826 = vadd.xlane.f32.xlu1 %v1525_v2 }
 0x192   : > { %696 = vmax.xlane.f32.xlu2 %v2405_v1 }
 0x199   : > { %698 = vmax.xlane.f32.xlu0 %v2414_v4  ;;  %862 = vmax.xlane.f32.xlu1 %v2417_v5 }
 0x19a   : > { %1176 = vmax.xlane.f32.xlu2 %v2423_v6 }
 0x1a1   : > { %1178 = vmax.xlane.f32.xlu0 %v2436_v8  ;;  %1022 = vmax.xlane.f32.xlu1 %v2439_v9 }
 0x1a2   : > { %662 = vadd.xlane.f32.xlu2 %v1511_v10 }
 0x1a9   : > { %664 = vadd.xlane.f32.xlu0 %v1512_v13  ;;  %700 = vmax.xlane.f32.xlu1 %v2450_v14 }
 0x1aa   : > { %986 = vadd.xlane.f32.xlu2 %v1537_v11 }
 0x1b1   : > { %1180 = vmax.xlane.f32.xlu1 %v2461_v17  ;;  %1146 = vadd.xlane.f32.xlu0 %v1549_v15 }
 0x1b2   : > { %1144 = vadd.xlane.f32.xlu2 %v1548_v18 }
 0x1b9   : > { %666 = vadd.xlane.f32.xlu1 %v1513_v21 }
 0x1ba   : > { %1182 = vmax.xlane.f32.xlu2 %v2472_v22 }
 0x1c2   : > { %702 = vmax.xlane.f32.xlu2 %v2476_v20 }
 0x1c4   : > { %v2479_v24 = vpop.xlane.xlu1 %540  ;;  %v2497_v44 = vpop.xlane.xlu0 %504 }
 0x1c5   : > { %v2481_v30 = vpop.xlane.xlu2 %500  ;;  %vm546_vm5 = vcmp.eq.f32.partialorder %v2278_v28, %v2479_v24 }
 0x1c6   : > { %v1504_v31 = vsel %vm546_vm5, 1.0, %v3116_v29  ;;  %v2507_v53 = vsel %vm546_vm5, -inf, %v2278_v28 }
 0x1ca   : > { %560 = vadd.xlane.f32.xlu2 %v1504_v31 }
 0x1cc   : > { %v2486_v23 = vpop.xlane.xlu1 %820 }
 0x1cd   : > { %v2488_v33 = vpop.xlane.xlu2 %536 }
 0x1ce   : > { %vm544_vm6 = vcmp.eq.f32.partialorder %v2289_v34, %v2488_v33 }
 0x1cf   : > { %v1502_v25 = vsel %vm544_vm6, 1.0, %v3116_v29  ;;  %v2494_v40 = vsel %vm544_vm6, -inf, %v2289_v34 }
 0x1d0   : > { %556 = vadd.xlane.f32.xlu0 %v1502_v25  ;;  %592 = vmax.xlane.f32.xlu1 %v2494_v40 }
 0x1d4   : > { %v2499_v45 = vpop.xlane.xlu1 %856  ;;  %v2510_v34 = vpop.xlane.xlu0 %538 }
 0x1d5   : > { %v2501_v48 = vpop.xlane.xlu2 %980  ;;  %vm864_vm7 = vcmp.eq.f32.partialorder %v2303_v38, %v2499_v45  ;;  %vm545_vm9 = vcmp.eq.f32.partialorder %v2306_v39, %v2510_v34 }
 0x1d6   : > { %v1526_v52 = vsel %vm864_vm7, 1.0, %v3116_v29  ;;  %v2522_v60 = vsel %vm864_vm7, -inf, %v2303_v38  ;;  %v2538_v38 = vsel %vm545_vm9, -inf, %v2306_v39 }
 0x1d7   : > { %876 = vadd.xlane.f32.xlu2 %v1526_v52 }
 0x1d8   : > { %596 = vmax.xlane.f32.xlu0 %v2507_v53 }
 0x1dc   : > { %v2512_v54 = vpop.xlane.xlu1 %1016  ;;  %v2529_v2 = vpop.xlane.xlu0 %982 }
 0x1dd   : > { %v2514_v56 = vpop.xlane.xlu2 %502  ;;  %vm1024_vm8 = vcmp.eq.f32.partialorder %v2318_v43, %v2512_v54 }
 0x1de   : > { %v2519_v57 = vsel %vm1024_vm8, -inf, %v2318_v43  ;;  %v1538_v28 = vsel %vm1024_vm8, 1.0, %v3116_v29  ;;  %v1503_v43 = vsel %vm545_vm9, 1.0, %v3116_v29 }
 0x1df   : > { %912 = vmax.xlane.f32.xlu2 %v2522_v60  ;;  %1036 = vadd.xlane.f32.xlu1 %v1538_v28 }
 0x1e0   : > { %1072 = vmax.xlane.f32.xlu0 %v2519_v57 }
 0x1e4   : > { %v2531_v10 = vpop.xlane.xlu1 %506 }
 0x1e5   : > { %v2533_v13 = vpop.xlane.xlu2 %542 }
 0x1e6   : > { %vm547_vm10 = vcmp.eq.f32.partialorder %v2334_v49, %v2533_v13 }
 0x1e7   : > { %v1505_v11 = vsel %vm547_vm10, 1.0, %v3116_v29  ;;  %594 = vmax.xlane.f32.xlu2 %v2538_v38  ;;  %558 = vadd.xlane.f32.xlu1 %v1503_v43  ;;  %v2550_v31 = vsel %vm547_vm10, -inf, %v2334_v49 }
 0x1e8   : > { %562 = vadd.xlane.f32.xlu0 %v1505_v11 }
 0x1ec   : > { %v2543_v15 = vpop.xlane.xlu1 %660  ;;  %v2545_v18 = vpop.xlane.xlu0 %1140 }
 0x1ed   : > { %v2547_v21 = vpop.xlane.xlu2 %822 }
 0x1ef   : > { %598 = vmax.xlane.f32.xlu1 %v2550_v31 }
 0x1f4   : > { %v2553_v39 = vpop.xlane.xlu0 %824  ;;  %v2557_v52 = vpop.xlane.xlu1 %984 }
 0x1f5   : > { %v2555_v25 = vpop.xlane.xlu2 %858 }
 0x1f6   : > { %vm865_vm11 = vcmp.eq.f32.partialorder %v2368_v58, %v2555_v25 }
 0x1f7   : > { %v1527_v28 = vsel %vm865_vm11, 1.0, %v3116_v29  ;;  %v2575_v16 = vsel %vm865_vm11, -inf, %v2368_v58 }
 0x1f8   : > { %878 = vadd.xlane.f32.xlu0 %v1527_v28 }
 0x1fc   : > { %v2562_v43 = vpop.xlane.xlu0 %860  ;;  %v2568_v49 = vpop.xlane.xlu1 %1142 }
 0x1fd   : > { %v2564_v11 = vpop.xlane.xlu2 %1018  ;;  %3151 = vst [vmem:[#allocation29_spill] sm:$0xff] %v2568_v49  ;;  %vm866_vm14 = vcmp.eq.f32.partialorder %v2380_v61, %v2562_v43 }
 0x1fe   : > { %vm1025_vm12 = vcmp.eq.f32.partialorder %v2386_v62, %v2564_v11  ;;  %v2613_v49 = vsel %vm866_vm14, -inf, %v2380_v61 }
 0x1ff   : > { %v1539_v12 = vsel %vm1025_vm12, 1.0, %v3116_v29  ;;  %v2572_v19 = vsel %vm1025_vm12, -inf, %v2386_v62 }
 0x200   : > { %1038 = vadd.xlane.f32.xlu2 %v1539_v12  ;;  %1074 = vmax.xlane.f32.xlu1 %v2572_v19 }
 0x201   : > { %914 = vmax.xlane.f32.xlu0 %v2575_v16 }
 0x204   : > { %v2581_v7 = vpop.xlane.xlu0 %1020  ;;  %v2590_v58 = vpop.xlane.xlu1 %826 }
 0x205   : > { %v2579_v28 = vpop.xlane.xlu2 %696  ;;  %3152 = vst [vmem:[#allocation30_spill] sm:$0xff] %v2581_v7  ;;  %vm1026_vm0 = vcmp.eq.f32.partialorder %v2398_v0, %v2581_v7 }
 0x206   : > { %vm704_vm13 = vcmp.eq.f32.partialorder %v2405_v1, %v2579_v28  ;;  %3153 = vst [vmem:[#allocation31_spill] sm:$0xff] %v2590_v58 }
 0x207   : > { %v1514_v3 = vsel %vm704_vm13, 1.0, %v3116_v29  ;;  %v2587_v62 = vsel %vm704_vm13, -inf, %v2405_v1 }
 0x208   : > { %752 = vmax.xlane.f32.xlu1 %v2587_v62 }
 0x209   : > { %716 = vadd.xlane.f32.xlu0 %v1514_v3  ;;  %v1528_v3 = vsel %vm866_vm14, 1.0, %v3116_v29 }
 0x20c   : > { %v2602_v1 = vpop.xlane.xlu0 %698  ;;  %v2606_v58 = vpop.xlane.xlu1 %862 }
 0x20d   : > { %v2592_v12 = vpop.xlane.xlu2 %1176  ;;  %3154 = vst [vmem:[#allocation32_spill] sm:$0xff] %v2602_v1  ;;  %vm705_vm1 = vcmp.eq.f32.partialorder %v2414_v4, %v2602_v1  ;;  %vm867_vm3 = vcmp.eq.f32.partialorder %v2417_v5, %v2606_v58 }
 0x20e   : > { %vm1184_vm15 = vcmp.eq.f32.partialorder %v2423_v6, %v2592_v12  ;;  %3155 = vst [vmem:[#allocation33_spill] sm:$0xff] %v2606_v58  ;;  %v2632_v61 = vsel %vm705_vm1, -inf, %v2414_v4  ;;  %v1529_v4 = vsel %vm867_vm3, 1.0, %v3116_v29 }
 0x20f   : > { %v1550_v63 = vsel %vm1184_vm15, 1.0, %v3116_v29  ;;  %v2600_v59 = vsel %vm1184_vm15, -inf, %v2423_v6  ;;  %v2616_v6 = vsel %vm1026_vm0, -inf, %v2398_v0  ;;  %v1515_v0 = vsel %vm705_vm1, 1.0, %v3116_v29 }
 0x210   : > { %1196 = vadd.xlane.f32.xlu2 %v1550_v63  ;;  %1232 = vmax.xlane.f32.xlu1 %v2600_v59  ;;  %v1540_v63 = vsel %vm1026_vm0, 1.0, %v3116_v29 }
 0x211   : > { %880 = vadd.xlane.f32.xlu0 %v1528_v3 }
 0x214   : > { %v2621_v3 = vpop.xlane.xlu0 %1178  ;;  %v2625_v7 = vpop.xlane.xlu1 %1022 }
 0x215   : > { %v2610_v51 = vpop.xlane.xlu2 %662  ;;  %3157 = vst [vmem:[#allocation35_spill] sm:$0xff] %v2621_v3  ;;  %vm1185_vm2 = vcmp.eq.f32.partialorder %v2436_v8, %v2621_v3  ;;  %vm1027_vm4 = vcmp.eq.f32.partialorder %v2439_v9, %v2625_v7 }
 0x216   : > { %3156 = vst [vmem:[#allocation34_spill] sm:$0xff] %v2610_v51  ;;  %v2647_v3 = vsel %vm1185_vm2, -inf, %v2436_v8 }
 0x217   : > { %3158 = vst [vmem:[#allocation36_spill] sm:$0xff] %v2625_v7  ;;  %v1541_v7 = vsel %vm1027_vm4, 1.0, %v3116_v29 }
 0x218   : > { %916 = vmax.xlane.f32.xlu1 %v2613_v49  ;;  %1076 = vmax.xlane.f32.xlu2 %v2616_v6  ;;  %3162 = vst [vmem:[#allocation40_spill] sm:$0xff] %v2647_v3 }
 0x219   : > { %1040 = vadd.xlane.f32.xlu0 %v1540_v63  ;;  %v1551_v63 = vsel %vm1185_vm2, 1.0, %v3116_v29 }
 0x21d   : > { %v2627_v51 = vpop.xlane.xlu2 %986 }
 0x21e   : > { %3159 = vst [vmem:[#allocation37_spill] sm:$0xff] %v2627_v51  ;;  %v2643_v51 = vpop.xlane.xlu1 %700 }
 0x21f   : > { %3161 = vst [vmem:[#allocation39_spill] sm:$0xff] %v2643_v51  ;;  %vm706_vm5 = vcmp.eq.f32.partialorder %v2450_v14, %v2643_v51 }
 0x220   : > { %754 = vmax.xlane.f32.xlu2 %v2632_v61  ;;  %718 = vadd.xlane.f32.xlu1 %v1515_v0  ;;  %v2651_v0 = vsel %vm1027_vm4, -inf, %v2439_v9  ;;  %v2664_v8 = vsel %vm706_vm5, -inf, %v2450_v14  ;;  %v2666_v9 = vpop.xlane.xlu0 %664 }
 0x221   : > { %1198 = vadd.xlane.f32.xlu0 %v1551_v63  ;;  %3165 = vst [vmem:[#allocation43_spill] sm:$0xff] %v2664_v8 }
 0x222   : > { %3166 = vst [vmem:[#allocation44_spill] sm:$0xff] %v2666_v9 }
 0x225   : > { %v2639_v1 = vpop.xlane.xlu2 %1144 }
 0x226   : > { %3160 = vst [vmem:[#allocation38_spill] sm:$0xff] %v2639_v1  ;;  %v2660_v1 = vsel %vm867_vm3, -inf, %v2417_v5 }
 0x227   : > { %3164 = vst [vmem:[#allocation42_spill] sm:$0xff] %v2660_v1 }
 0x228   : > { %882 = vadd.xlane.f32.xlu1 %v1529_v4  ;;  %1234 = vmax.xlane.f32.xlu2 %v2647_v3  ;;  %v2668_v4 = vpop.xlane.xlu1 %1180  ;;  %v510_v3 = vmin.f32 %v2497_v44, 3.0  ;;  %v508_v44 = vmin.f32 %v2481_v30, 3.0 }
 0x229   : > { %1078 = vmax.xlane.f32.xlu0 %v2651_v0  ;;  %3167 = vst [vmem:[#allocation45_spill] sm:$0xff] %v2668_v4  ;;  %vm1186_vm6 = vcmp.eq.f32.partialorder %v2461_v17, %v2668_v4 }
 0x22a   : > { %v1552_v5 = vsel %vm1186_vm6, 1.0, %v3116_v29  ;;  %v2679_v14 = vsel %vm1186_vm6, -inf, %v2461_v17  ;;  %v530_v4 = vsub.f32 3.0, %v510_v3  ;;  %vm514_vm9 = vcmp.gt.f32.partialorder %v510_v3, 0.0 }
 0x22b   : > { %3169 = vst [vmem:[#allocation47_spill] sm:$0xff] %v2679_v14  ;;  %vm512_vm12 = vcmp.gt.f32.partialorder %v508_v44, 0.0 }
 0x22d   : > { %v2654_v63 = vpop.xlane.xlu2 %1182 }
 0x22e   : > { %3163 = vst [vmem:[#allocation41_spill] sm:$0xff] %v2654_v63  ;;  %vm1187_vm7 = vcmp.eq.f32.partialorder %v2472_v22, %v2654_v63 }
 0x230   : > { %1042 = vadd.xlane.f32.xlu1 %v1541_v7  ;;  %918 = vmax.xlane.f32.xlu2 %v2660_v1  ;;  %v1516_v7 = vsel %vm706_vm5, 1.0, %v3116_v29  ;;  %v2682_v1 = vpop.xlane.xlu0 %1146 }
 0x231   : > { %756 = vmax.xlane.f32.xlu0 %v2664_v8  ;;  %3170 = vst [vmem:[#allocation48_spill] sm:$0xff] %v2682_v1  ;;  %v2684_v8 = vpop.xlane.xlu1 %666  ;;  %v1553_v1 = vsel %vm1187_vm7, 1.0, %v3116_v29 }
 0x232   : > { %3171 = vst [vmem:[#allocation49_spill] sm:$0xff] %v2684_v8 }
 0x235   : > { %v2673_v51 = vpop.xlane.xlu2 %702 }
 0x236   : > { %3168 = vst [vmem:[#allocation46_spill] sm:$0xff] %v2673_v51  ;;  %vm707_vm8 = vcmp.eq.f32.partialorder %v2476_v20, %v2673_v51 }
 0x237   : > { %v1517_v30 = vsel %vm707_vm8, 1.0, %v3116_v29 }
 0x238   : > { %1200 = vadd.xlane.f32.xlu1 %v1552_v5  ;;  %720 = vadd.xlane.f32.xlu2 %v1516_v7  ;;  %v518_v5 = vmul.f32 %v510_v3, %v2269_v26  ;;  %v2693_v7 = vsel %vm1187_vm7, -inf, %v2472_v22  ;;  %v528_v22 = vsub.f32 3.0, %v508_v44 }
 0x239   : > { %1236 = vmax.xlane.f32.xlu0 %v2679_v14  ;;  %3172 = vst [vmem:[#allocation50_spill] sm:$0xff] %v2693_v7 }
 0x23a   : > { %v522_v26 = vsel %vm514_vm9, %v518_v5, 0.0 }
 0x23d   : > { %v561_v9 = vpop.xlane.xlu2 %560 }
 0x23e   : > { %v566_v17 = vmin.f32 %v561_v9, %v530_v4 }
 0x240   : > { %vm570_vm10 = vcmp.gt.f32.partialorder %v566_v17, 0.0  ;;  %v574_v8 = vmul.f32 %v566_v17, %v2479_v24  ;;  %1238 = vmax.xlane.f32.xlu1 %v2693_v7  ;;  %1202 = vadd.xlane.f32.xlu2 %v1553_v1  ;;  %v2702_v63 = vsub.f32 %v530_v4, %v566_v17  ;;  %v516_v24 = vmul.f32 %v508_v44, %v2271_v27 }
 0x241   : > { %722 = vadd.xlane.f32.xlu0 %v1517_v30  ;;  %v828_v1 = vmin.f32 %v2486_v23, 3.0 }
 0x242   : > { %v578_v3 = vsel %vm570_vm10, %v574_v8, 0.0  ;;  %v2719_v8 = vsel %vm707_vm8, -inf, %v2476_v20  ;;  %v988_v20 = vmin.f32 %v2501_v48, 3.0 }
 0x243   : > { %v2704_v9 = vpop.xlane.xlu1 %592  ;;  %v557_v14 = vpop.xlane.xlu0 %556  ;;  %v2706_v58 = vadd.f32 %v578_v3, %v522_v26  ;;  %vm832_vm14 = vcmp.gt.f32.partialorder %v828_v1, 0.0 }
 0x244   : > { %v564_v7 = vmin.f32 %v557_v14, %v528_v22  ;;  %vm600_vm11 = vcmp.eq.f32.partialorder %v2494_v40, %v2704_v9  ;;  %v520_v14 = vsel %vm512_vm12, %v516_v24, 0.0  ;;  %v848_v40 = vsub.f32 3.0, %v828_v1 }
 0x245   : > { %v1506_v27 = vsel %vm600_vm11, 1.0, %v3116_v29  ;;  %vm992_vm2 = vcmp.gt.f32.partialorder %v988_v20, 0.0 }
 0x246   : > { %vm568_vm13 = vcmp.gt.f32.partialorder %v564_v7, 0.0  ;;  %v572_v4 = vmul.f32 %v564_v7, %v2488_v33  ;;  %v2713_v5 = vsub.f32 %v528_v22, %v564_v7  ;;  %v836_v33 = vmul.f32 %v828_v1, %v2283_v32 }
 0x248   : > { %v576_v17 = vsel %vm568_vm13, %v572_v4, 0.0  ;;  %758 = vmax.xlane.f32.xlu1 %v2719_v8  ;;  %612 = vadd.xlane.f32.xlu2 %v1506_v27  ;;  %v840_v22 = vsel %vm832_vm14, %v836_v33, 0.0  ;;  %v1008_v27 = vsub.f32 3.0, %v988_v20 }
 0x249   : > { %v2723_v23 = vadd.f32 %v576_v17, %v520_v14 }
 0x24a   : > { %v877_v44 = vpop.xlane.xlu2 %876 }
 0x24b   : > { %v884_v7 = vmin.f32 %v877_v44, %v848_v40  ;;  %v2726_v30 = vpop.xlane.xlu0 %596 }
 0x24c   : > { %vm602_vm15 = vcmp.eq.f32.partialorder %v2507_v53, %v2726_v30  ;;  %v996_v53 = vmul.f32 %v988_v20, %v2294_v36  ;;  %v511_v36 = vmin.f32 %v2531_v10, 3.0 }
 0x24d   : > { %vm888_vm0 = vcmp.gt.f32.partialorder %v884_v7, 0.0  ;;  %v892_v26 = vmul.f32 %v884_v7, %v2499_v45  ;;  %v2732_v3 = vsub.f32 %v848_v40, %v884_v7  ;;  %v1508_v4 = vsel %vm602_vm15, 1.0, %v3116_v29 }
 0x24e   : > { %v509_v40 = vmin.f32 %v2514_v56, 3.0  ;;  %v1000_v7 = vsel %vm992_vm2, %v996_v53, 0.0  ;;  %v531_v56 = vsub.f32 3.0, %v511_v36  ;;  %v519_v10 = vmul.f32 %v511_v36, %v2291_v35 }
 0x24f   : > { %v896_v24 = vsel %vm888_vm0, %v892_v26, 0.0  ;;  %vm515_vm7 = vcmp.gt.f32.partialorder %v511_v36, 0.0 }
 0x250   : > { %616 = vadd.xlane.f32.xlu1 %v1508_v4  ;;  %v2735_v32 = vadd.f32 %v896_v24, %v840_v22  ;;  %v529_v22 = vsub.f32 3.0, %v509_v40  ;;  %v517_v4 = vmul.f32 %v509_v40, %v2296_v37  ;;  %vm513_vm6 = vcmp.gt.f32.partialorder %v509_v40, 0.0 }
 0x251   : > { %v523_v40 = vsel %vm515_vm7, %v519_v10, 0.0 }
 0x252   : > { %v2737_v14 = vpop.xlane.xlu2 %912  ;;  %v1037_v1 = vpop.xlane.xlu1 %1036 }
 0x253   : > { %v1044_v17 = vmin.f32 %v1037_v1, %v1008_v27  ;;  %v2740_v48 = vpop.xlane.xlu0 %1072  ;;  %vm920_vm1 = vcmp.eq.f32.partialorder %v2522_v60, %v2737_v14 }
 0x254   : > { %v1530_v45 = vsel %vm920_vm1, 1.0, %v3116_v29  ;;  %vm1080_vm3 = vcmp.eq.f32.partialorder %v2519_v57, %v2740_v48 }
 0x255   : > { %vm1048_vm4 = vcmp.gt.f32.partialorder %v1044_v17, 0.0  ;;  %v1052_v44 = vmul.f32 %v1044_v17, %v2512_v54  ;;  %932 = vadd.xlane.f32.xlu2 %v1530_v45  ;;  %v2749_v33 = vsub.f32 %v1008_v27, %v1044_v17  ;;  %v1542_v60 = vsel %vm1080_vm3, 1.0, %v3116_v29 }
 0x257   : > { %v1056_v26 = vsel %vm1048_vm4, %v1052_v44, 0.0 }
 0x258   : > { %1092 = vadd.xlane.f32.xlu1 %v1542_v60  ;;  %v2753_v20 = vadd.f32 %v1056_v26, %v1000_v7  ;;  %v521_v7 = vsel %vm513_vm6, %v517_v4, 0.0 }
 0x25a   : > { %v2755_v24 = vpop.xlane.xlu2 %594  ;;  %v559_v57 = vpop.xlane.xlu1 %558 }
 0x25b   : > { %v565_v54 = vmin.f32 %v559_v57, %v529_v22  ;;  %v563_v1 = vpop.xlane.xlu0 %562  ;;  %vm601_vm5 = vcmp.eq.f32.partialorder %v2538_v38, %v2755_v24 }
 0x25c   : > { %v567_v27 = vmin.f32 %v563_v1, %v531_v56  ;;  %v1507_v53 = vsel %vm601_vm5, 1.0, %v3116_v29 }
 0x25d   : > { %vm569_vm8 = vcmp.gt.f32.partialorder %v565_v54, 0.0  ;;  %v573_v17 = vmul.f32 %v565_v54, %v2510_v34  ;;  %614 = vadd.xlane.f32.xlu0 %v1507_v53  ;;  %v2763_v45 = vsub.f32 %v529_v22, %v565_v54  ;;  %v989_v54 = vmin.f32 %v2529_v2, 3.0 }
 0x25e   : > { %vm571_vm9 = vcmp.gt.f32.partialorder %v567_v27, 0.0  ;;  %v575_v37 = vmul.f32 %v567_v27, %v2533_v13  ;;  %v2766_v44 = vsub.f32 %v531_v56, %v567_v27  ;;  %v829_v13 = vmin.f32 %v2547_v21, 3.0 }
 0x25f   : > { %v577_v38 = vsel %vm569_vm8, %v573_v17, 0.0  ;;  %v1009_v53 = vsub.f32 3.0, %v989_v54  ;;  %vm993_vm14 = vcmp.gt.f32.partialorder %v989_v54, 0.0 }
 0x260   : > { %v579_v26 = vsel %vm571_vm9, %v575_v37, 0.0  ;;  %v2768_v35 = vadd.f32 %v577_v38, %v521_v7  ;;  %v849_v22 = vsub.f32 3.0, %v829_v13  ;;  %v837_v56 = vmul.f32 %v829_v13, %v2311_v41 }
 0x261   : > { %v2770_v60 = vadd.f32 %v579_v26, %v523_v40  ;;  %vm833_vm11 = vcmp.gt.f32.partialorder %v829_v13, 0.0  ;;  %v997_v7 = vmul.f32 %v989_v54, %v2313_v42  ;;  %v668_v42 = vmin.f32 %v2543_v15, 3.0 }
 0x262   : > { %v2772_v36 = vpop.xlane.xlu1 %598  ;;  %v841_v27 = vsel %vm833_vm11, %v837_v56, 0.0  ;;  %v1148_v15 = vmin.f32 %v2545_v18, 3.0  ;;  %v830_v54 = vmin.f32 %v2553_v39, 3.0 }
 0x263   : > { %vm603_vm10 = vcmp.eq.f32.partialorder %v2550_v31, %v2772_v36  ;;  %vm672_vm2 = vcmp.gt.f32.partialorder %v668_v42, 0.0 }
 0x264   : > { %v1509_v34 = vsel %vm603_vm10, 1.0, %v3116_v29  ;;  %vm1152_vm5 = vcmp.gt.f32.partialorder %v1148_v15, 0.0  ;;  %v838_v39 = vmul.f32 %v830_v54, %v2356_v55  ;;  %vm834_vm6 = vcmp.gt.f32.partialorder %v830_v54, 0.0 }
 0x265   : > { %618 = vadd.xlane.f32.xlu2 %v1509_v34  ;;  %v1001_v34 = vsel %vm993_vm14, %v997_v7, 0.0 }
 0x266   : > { %v842_v55 = vsel %vm834_vm6, %v838_v39, 0.0 }
 0x26b   : > { %v879_v57 = vpop.xlane.xlu0 %878 }
 0x26c   : > { %v885_v4 = vmin.f32 %v879_v57, %v849_v22  ;;  %v688_v57 = vsub.f32 3.0, %v668_v42 }
 0x26e   : > { %vm889_vm12 = vcmp.gt.f32.partialorder %v885_v4, 0.0  ;;  %v893_v1 = vmul.f32 %v885_v4, %v2555_v25  ;;  %v2781_v10 = vsub.f32 %v849_v22, %v885_v4 }
 0x270   : > { %v897_v31 = vsel %vm889_vm12, %v893_v1, 0.0 }
 0x271   : > { %v2783_v17 = vadd.f32 %v897_v31, %v841_v27 }
 0x273   : > { %v1039_v37 = vpop.xlane.xlu2 %1038  ;;  %v2785_v21 = vpop.xlane.xlu1 %1074 }
 0x274   : > { %v1045_v41 = vmin.f32 %v1039_v37, %v1009_v53  ;;  %v2788_v38 = vpop.xlane.xlu0 %914  ;;  %vm1081_vm13 = vcmp.eq.f32.partialorder %v2572_v19, %v2785_v21  ;;  %v1168_v37 = vsub.f32 3.0, %v1148_v15 }
 0x275   : > { %v1543_v2 = vsel %vm1081_vm13, 1.0, %v3116_v29  ;;  %vm921_vm15 = vcmp.eq.f32.partialorder %v2575_v16, %v2788_v38  ;;  %v676_v16 = vmul.f32 %v668_v42, %v2330_v47 }
 0x276   : > { %vm1049_vm0 = vcmp.gt.f32.partialorder %v1045_v41, 0.0  ;;  %v1053_v25 = vmul.f32 %v1045_v41, %v2564_v11  ;;  %1094 = vadd.xlane.f32.xlu2 %v1543_v2  ;;  %v1531_v40 = vsel %vm921_vm15, 1.0, %v3116_v29  ;;  %v2797_v26 = vsub.f32 %v1009_v53, %v1045_v41 }
 0x277   : > { %934 = vadd.xlane.f32.xlu0 %v1531_v40  ;;  %v680_v31 = vsel %vm672_vm2, %v676_v16, 0.0  ;;  %v850_v41 = vsub.f32 3.0, %v830_v54  ;;  %v1156_v2 = vmul.f32 %v1148_v15, %v2339_v50  ;;  %v990_v50 = vmin.f32 %v2557_v52, 3.0 }
 0x278   : > { %v1057_v13 = vsel %vm1049_vm0, %v1053_v25, 0.0 }
 0x279   : > { %v2800_v19 = vadd.f32 %v1057_v13, %v1001_v34  ;;  %v1010_v54 = vsub.f32 3.0, %v990_v50  ;;  %v998_v52 = vmul.f32 %v990_v50, %v2328_v46  ;;  %vm994_vm11 = vcmp.gt.f32.partialorder %v990_v50, 0.0 }
 0x27b   : > { %v2802_v22 = vpop.xlane.xlu1 %752 }
 0x27c   : > { %v717_v56 = vpop.xlane.xlu0 %716  ;;  %vm760_vm1 = vcmp.eq.f32.partialorder %v2587_v62, %v2802_v22 }
 0x27d   : > { %v724_v11 = vmin.f32 %v717_v56, %v688_v57  ;;  %v1518_v4 = vsel %vm760_vm1, 1.0, %v3116_v29 }
 0x27e   : > { %772 = vadd.xlane.f32.xlu2 %v1518_v4 }
 0x27f   : > { %vm728_vm3 = vcmp.gt.f32.partialorder %v724_v11, 0.0  ;;  %v732_v1 = vmul.f32 %v724_v11, %v2579_v28  ;;  %v2811_v27 = vsub.f32 %v688_v57, %v724_v11 }
 0x281   : > { %v736_v53 = vsel %vm728_vm3, %v732_v1, 0.0 }
 0x282   : > { %v2813_v62 = vadd.f32 %v736_v53, %v680_v31 }
 0x283   : > { %v1197_v47 = vpop.xlane.xlu2 %1196  ;;  %v2815_v7 = vpop.xlane.xlu1 %1232 }
 0x284   : > { %v1204_v18 = vmin.f32 %v1197_v47, %v1168_v37  ;;  %v881_v25 = vpop.xlane.xlu0 %880  ;;  %vm1240_vm4 = vcmp.eq.f32.partialorder %v2600_v59, %v2815_v7  ;;  %v1160_v59 = vsel %vm1152_vm5, %v1156_v2, 0.0 }
 0x285   : > { %v886_v28 = vmin.f32 %v881_v25, %v850_v41  ;;  %v1554_v40 = vsel %vm1240_vm4, 1.0, %v3116_v29 }
 0x286   : > { %vm1208_vm7 = vcmp.gt.f32.partialorder %v1204_v18, 0.0  ;;  %v1212_v42 = vmul.f32 %v1204_v18, %v2592_v12  ;;  %1252 = vadd.xlane.f32.xlu2 %v1554_v40  ;;  %v2823_v34 = vsub.f32 %v1168_v37, %v1204_v18  ;;  %v3173_v37 = vld [vmem:[#allocation34_spill] sm:$0xff] }
 0x287   : > { %vm890_vm8 = vcmp.gt.f32.partialorder %v886_v28, 0.0  ;;  %v894_v13 = vmul.f32 %v886_v28, %v2562_v43  ;;  %v2827_v57 = vsub.f32 %v850_v41, %v886_v28  ;;  %v669_v47 = vmin.f32 %v3173_v37, 3.0  ;;  %v3174_v41 = vld [vmem:[#allocation29_spill] sm:$0xff]  ;;  %v3175_v18 = vld [vmem:[#allocation30_spill] sm:$0xff] }
 0x288   : > { %v1216_v56 = vsel %vm1208_vm7, %v1212_v42, 0.0  ;;  %v1149_v2 = vmin.f32 %v3174_v41, 3.0 }
 0x289   : > { %v898_v16 = vsel %vm890_vm8, %v894_v13, 0.0  ;;  %v2829_v11 = vadd.f32 %v1216_v56, %v1160_v59  ;;  %v689_v46 = vsub.f32 3.0, %v669_v47  ;;  %v3176_v13 = vld [vmem:[#allocation21_spill] sm:$0xff]  ;;  %vm673_vm15 = vcmp.gt.f32.partialorder %v669_v47, 0.0 }
 0x28a   : > { %v2831_v4 = vadd.f32 %v898_v16, %v842_v55  ;;  %v1169_v50 = vsub.f32 3.0, %v1149_v2  ;;  %vm1153_vm13 = vcmp.gt.f32.partialorder %v1149_v2, 0.0  ;;  %v677_v59 = vmul.f32 %v669_v47, %v3176_v13  ;;  %v3177_v16 = vld [vmem:[#allocation22_spill] sm:$0xff] }
 0x28b   : > { %v2833_v15 = vpop.xlane.xlu1 %916  ;;  %v2835_v12 = vpop.xlane.xlu2 %1076 }
 0x28c   : > { %v1041_v1 = vpop.xlane.xlu0 %1040  ;;  %vm922_vm9 = vcmp.eq.f32.partialorder %v2613_v49, %v2833_v15  ;;  %vm1082_vm10 = vcmp.eq.f32.partialorder %v2616_v6, %v2835_v12  ;;  %v1002_v6 = vsel %vm994_vm11, %v998_v52, 0.0 }
 0x28d   : > { %v1046_v43 = vmin.f32 %v1041_v1, %v1010_v54  ;;  %v1532_v31 = vsel %vm922_vm9, 1.0, %v3116_v29  ;;  %v1544_v53 = vsel %vm1082_vm10, 1.0, %v3116_v29 }
 0x28e   : > { %936 = vadd.xlane.f32.xlu1 %v1532_v31  ;;  %1096 = vadd.xlane.f32.xlu0 %v1544_v53  ;;  %v3179_v53 = vld [vmem:[#allocation32_spill] sm:$0xff] }
 0x28f   : > { %vm1050_vm12 = vcmp.gt.f32.partialorder %v1046_v43, 0.0  ;;  %v1054_v49 = vmul.f32 %v1046_v43, %v3175_v18  ;;  %v2847_v25 = vsub.f32 %v1010_v54, %v1046_v43  ;;  %v1157_v54 = vmul.f32 %v1149_v2, %v3177_v16  ;;  %v3178_v43 = vld [vmem:[#allocation31_spill] sm:$0xff]  ;;  %v3187_v2 = vld [vmem:[#allocation33_spill] sm:$0xff] }
 0x290   : > { %v831_v31 = vmin.f32 %v3178_v43, 3.0  ;;  %v3180_v18 = vld [vmem:[#allocation35_spill] sm:$0xff] }
 0x291   : > { %v1058_v39 = vsel %vm1050_vm12, %v1054_v49, 0.0  ;;  %v1161_v47 = vsel %vm1153_vm13, %v1157_v54, 0.0 }
 0x292   : > { %v2849_v28 = vadd.f32 %v1058_v39, %v1002_v6  ;;  %vm835_vm2 = vcmp.gt.f32.partialorder %v831_v31, 0.0 }
 0x293   : > { %v2851_v40 = vpop.xlane.xlu2 %754  ;;  %v719_v42 = vpop.xlane.xlu1 %718 }
 0x294   : > { %v725_v56 = vmin.f32 %v719_v42, %v689_v46  ;;  %v1199_v55 = vpop.xlane.xlu0 %1198  ;;  %vm761_vm14 = vcmp.eq.f32.partialorder %v2632_v61, %v2851_v40  ;;  %v681_v61 = vsel %vm673_vm15, %v677_v59, 0.0 }
 0x295   : > { %v1205_v1 = vmin.f32 %v1199_v55, %v1169_v50  ;;  %v1519_v52 = vsel %vm761_vm14, 1.0, %v3116_v29  ;;  %v851_v55 = vsub.f32 3.0, %v831_v31 }
 0x296   : > { %vm729_vm0 = vcmp.gt.f32.partialorder %v725_v56, 0.0  ;;  %v733_v37 = vmul.f32 %v725_v56, %v3179_v53  ;;  %774 = vadd.xlane.f32.xlu0 %v1519_v52  ;;  %v2860_v41 = vsub.f32 %v689_v46, %v725_v56  ;;  %v3184_v46 = vld [vmem:[#allocation23_spill] sm:$0xff] }
 0x297   : > { %vm1209_vm1 = vcmp.gt.f32.partialorder %v1205_v1, 0.0  ;;  %v1213_v49 = vmul.f32 %v1205_v1, %v3180_v18  ;;  %v2863_v6 = vsub.f32 %v1169_v50, %v1205_v1  ;;  %v839_v56 = vmul.f32 %v831_v31, %v3184_v46  ;;  %v3186_v50 = vld [vmem:[#allocation37_spill] sm:$0xff] }
 0x298   : > { %v737_v39 = vsel %vm729_vm0, %v733_v37, 0.0  ;;  %v991_v59 = vmin.f32 %v3186_v50, 3.0  ;;  %v3188_v1 = vmov 0.0   ;;  %v3193_v50 = vld [vmem:[#allocation44_spill] sm:$0xff] }
 0x299   : > { %3181 = vst [vmem:[#allocation34_spill] sm:$0xff] %v2863_v6  ;;  %v1217_v42 = vsel %vm1209_vm1, %v1213_v49, 0.0  ;;  %v2866_v13 = vadd.f32 %v737_v39, %v681_v61  ;;  %v843_v49 = vsel %vm835_vm2, %v839_v56, 0.0  ;;  %v3199_v6 = vld [vmem:[#allocation40_spill] sm:$0xff] }
 0x29a   : > { %v2868_v16 = vadd.f32 %v1217_v42, %v1161_v47  ;;  %v1011_v47 = vsub.f32 3.0, %v991_v59  ;;  %vm995_vm6 = vcmp.gt.f32.partialorder %v991_v59, 0.0 }
 0x29b   : > { %v883_v43 = vpop.xlane.xlu1 %882  ;;  %v2870_v53 = vpop.xlane.xlu2 %1234 }
 0x29c   : > { %3182 = vst [vmem:[#allocation29_spill] sm:$0xff] %v2868_v16  ;;  %v887_v52 = vmin.f32 %v883_v43, %v851_v55  ;;  %v2873_v29 = vpop.xlane.xlu0 %1078  ;;  %v3192_v43 = vld [vmem:[#allocation24_spill] sm:$0xff]  ;;  %vm1241_vm9 = vcmp.eq.f32.partialorder %v3199_v6, %v2870_v53 }
 0x29d   : > { %3183 = vst [vmem:[#allocation30_spill] sm:$0xff] %v2870_v53  ;;  %vm1083_vm3 = vcmp.eq.f32.partialorder %v2651_v0, %v2873_v29  ;;  %v999_v46 = vmul.f32 %v991_v59, %v3192_v43  ;;  %v670_v0 = vmin.f32 %v3193_v50, 3.0 }
 0x29e   : > { %3185 = vst [vmem:[#allocation21_spill] sm:$0xff] %v2873_v29  ;;  %vm891_vm4 = vcmp.gt.f32.partialorder %v887_v52, 0.0  ;;  %v895_v54 = vmul.f32 %v887_v52, %v3187_v2  ;;  %v1545_v37 = vsel %vm1083_vm3, 1.0, %v3188_v1  ;;  %v2880_v18 = vsub.f32 %v851_v55, %v887_v52  ;;  %v3195_v2 = vld [vmem:[#allocation42_spill] sm:$0xff] }
 0x29f   : > { %1098 = vadd.xlane.f32.xlu1 %v1545_v37  ;;  %v3196_v55 = vld [vmem:[#allocation38_spill] sm:$0xff]  ;;  %v3198_v37 = vld [vmem:[#allocation36_spill] sm:$0xff]  ;;  %v1003_v43 = vsel %vm995_vm6, %v999_v46, 0.0  ;;  %vm674_vm10 = vcmp.gt.f32.partialorder %v670_v0, 0.0  ;;  %v3203_v46 = vld [vmem:[#allocation47_spill] sm:$0xff] }
 0x2a0   : > { %3189 = vst [vmem:[#allocation22_spill] sm:$0xff] %v2880_v18  ;;  %v899_v61 = vsel %vm891_vm4, %v895_v54, 0.0  ;;  %v1150_v56 = vmin.f32 %v3196_v55, 3.0  ;;  %v3197_v54 = vld [vmem:[#allocation43_spill] sm:$0xff]  ;;  %v690_v55 = vsub.f32 3.0, %v670_v0 }
 0x2a1   : > { %v2882_v39 = vadd.f32 %v899_v61, %v843_v49 }
 0x2a2   : > { %v1170_v59 = vsub.f32 3.0, %v1150_v56  ;;  %vm1154_vm11 = vcmp.gt.f32.partialorder %v1150_v56, 0.0 }
 0x2a3   : > { %3190 = vst [vmem:[#allocation31_spill] sm:$0xff] %v2882_v39  ;;  %v1043_v42 = vpop.xlane.xlu1 %1042  ;;  %v2884_v31 = vpop.xlane.xlu2 %918 }
 0x2a4   : > { %3191 = vst [vmem:[#allocation32_spill] sm:$0xff] %v2884_v31  ;;  %v1047_v51 = vmin.f32 %v1043_v42, %v1011_v47  ;;  %v2888_v16 = vpop.xlane.xlu0 %756  ;;  %vm923_vm5 = vcmp.eq.f32.partialorder %v3195_v2, %v2884_v31 }
 0x2a5   : > { %3194 = vst [vmem:[#allocation35_spill] sm:$0xff] %v2888_v16  ;;  %v1533_v52 = vsel %vm923_vm5, 1.0, %v3188_v1  ;;  %vm762_vm7 = vcmp.eq.f32.partialorder %v3197_v54, %v2888_v16  ;;  %v3200_v16 = vld [vmem:[#allocation25_spill] sm:$0xff] }
 0x2a6   : > { %vm1051_vm8 = vcmp.gt.f32.partialorder %v1047_v51, 0.0  ;;  %v1055_v49 = vmul.f32 %v1047_v51, %v3198_v37  ;;  %938 = vadd.xlane.f32.xlu0 %v1533_v52  ;;  %v1520_v61 = vsel %vm762_vm7, 1.0, %v3188_v1  ;;  %v2898_v42 = vsub.f32 %v1011_v47, %v1047_v51  ;;  %v3201_v37 = vld [vmem:[#allocation27_spill] sm:$0xff] }
 0x2a7   : > { %776 = vadd.xlane.f32.xlu1 %v1520_v61  ;;  %v678_v31 = vmul.f32 %v670_v0, %v3200_v16  ;;  %v1158_v52 = vmul.f32 %v1150_v56, %v3201_v37  ;;  %v1555_v47 = vsel %vm1241_vm9, 1.0, %v3188_v1  ;;  %v3205_v61 = vld [vmem:[#allocation39_spill] sm:$0xff] }
 0x2a8   : > { %v1059_v50 = vsel %vm1051_vm8, %v1055_v49, 0.0  ;;  %v3204_v49 = vld [vmem:[#allocation45_spill] sm:$0xff] }
 0x2a9   : > { %v2900_v2 = vadd.f32 %v1059_v50, %v1003_v43  ;;  %v682_v0 = vsel %vm674_vm10, %v678_v31, 0.0  ;;  %v1162_v56 = vsel %vm1154_vm11, %v1158_v52, 0.0  ;;  %v3206_v52 = vld [vmem:[#allocation50_spill] sm:$0xff]  ;;  %vm1280_vm10 = vcmask 7168  }
 0x2aa   : > { %vm1285_vm11 = vcmask 15360  }
 0x2ab   : > { %v1201_v39 = vpop.xlane.xlu1 %1200  ;;  %v721_v54 = vpop.xlane.xlu2 %720 }
 0x2ac   : > { %v1206_v18 = vmin.f32 %v1201_v39, %v1170_v59  ;;  %v726_v29 = vmin.f32 %v721_v54, %v690_v55  ;;  %v2906_v51 = vpop.xlane.xlu0 %1236 }
 0x2ad   : > { %3202 = vst [vmem:[#allocation23_spill] sm:$0xff] %v2906_v51  ;;  %vm1242_vm12 = vcmp.eq.f32.partialorder %v3203_v46, %v2906_v51 }
 0x2ae   : > { %vm1210_vm13 = vcmp.gt.f32.partialorder %v1206_v18, 0.0  ;;  %v1214_v6 = vmul.f32 %v1206_v18, %v3204_v49  ;;  %vm730_vm14 = vcmp.gt.f32.partialorder %v726_v29, 0.0  ;;  %v734_v43 = vmul.f32 %v726_v29, %v3205_v61  ;;  %1254 = vadd.xlane.f32.xlu0 %v1555_v47 }
 0x2af   : > { %v1556_v16 = vsel %vm1242_vm12, 1.0, %v3188_v1  ;;  %v2914_v39 = vsub.f32 %v690_v55, %v726_v29  ;;  %v2916_v50 = vsub.f32 %v1170_v59, %v1206_v18  ;;  %vm1290_vm12 = vcmask 23552  }
 0x2b0   : > { %v1218_v54 = vsel %vm1210_vm13, %v1214_v6, 0.0  ;;  %v738_v37 = vsel %vm730_vm14, %v734_v43, 0.0  ;;  %1256 = vadd.xlane.f32.xlu1 %v1556_v16  ;;  %vm1295_vm14 = vcmask 31744  }
 0x2b1   : > { %v2918_v53 = vadd.f32 %v738_v37, %v682_v0  ;;  %v2920_v46 = vadd.f32 %v1218_v54, %v1162_v56 }
 0x2b3   : > { %v2922_v49 = vpop.xlane.xlu1 %1238  ;;  %v2924_v51 = vpop.xlane.xlu2 %1202 }
 0x2b4   : > { %vm1243_vm1 = vcmp.eq.f32.partialorder %v3206_v52, %v2922_v49  ;;  %v2939_v16 = vpop.xlane.xlu0 %722 }
 0x2bb   : > { %v2926_v47 = vpop.xlane.xlu1 %758  ;;  %v613_v61 = vpop.xlane.xlu2 %612 }
 0x2bc   : > { %v620_v29 = vmin.f32 %v613_v61, %v2713_v5  ;;  %vm763_vm15 = vcmp.eq.f32.partialorder %v2719_v8, %v2926_v47  ;;  %v1557_v5 = vsel %vm1243_vm1, 1.0, %v3188_v1 }
 0x2bd   : > { %v1521_v18 = vsel %vm763_vm15, 1.0, %v3188_v1 }
 0x2be   : > { %vm624_vm0 = vcmp.gt.f32.partialorder %v620_v29, 0.0  ;;  %v628_v31 = vmul.f32 %v620_v29, %v2704_v9  ;;  %778 = vadd.xlane.f32.xlu2 %v1521_v18 }
 0x2c0   : > { %v632_v59 = vsel %vm624_vm0, %v628_v31, 0.0 }
 0x2c1   : > { %v636_v55 = vadd.f32 %v632_v59, %v2723_v23 }
 0x2c3   : > { %v617_v6 = vpop.xlane.xlu1 %616 }
 0x2c4   : > { %v622_v43 = vmin.f32 %v617_v6, %v2702_v63 }
 0x2c6   : > { %vm626_vm2 = vcmp.gt.f32.partialorder %v622_v43, 0.0  ;;  %v630_v8 = vmul.f32 %v622_v43, %v2726_v30  ;;  %1258 = vadd.xlane.f32.xlu2 %v1557_v5 }
 0x2c8   : > { %v634_v0 = vsel %vm626_vm2, %v630_v8, 0.0  ;;  %v933_v9 = vpop.xlane.xlu2 %932 }
 0x2c9   : > { %v2942_v56 = vadd.f32 %v634_v0, %v2706_v58  ;;  %v940_v23 = vmin.f32 %v933_v9, %v2732_v3 }
 0x2cb   : > { %vm944_vm3 = vcmp.gt.f32.partialorder %v940_v23, 0.0  ;;  %v948_v54 = vmul.f32 %v940_v23, %v2737_v14  ;;  %v1093_v37 = vpop.xlane.xlu1 %1092 }
 0x2cc   : > { %v1100_v63 = vmin.f32 %v1093_v37, %v2749_v33 }
 0x2cd   : > { %v952_v1 = vsel %vm944_vm3, %v948_v54, 0.0 }
 0x2ce   : > { %v956_v61 = vadd.f32 %v952_v1, %v2735_v32  ;;  %vm1104_vm4 = vcmp.gt.f32.partialorder %v1100_v63, 0.0  ;;  %v1108_v30 = vmul.f32 %v1100_v63, %v2740_v48 }
 0x2d0   : > { %v1112_v29 = vsel %vm1104_vm4, %v1108_v30, 0.0  ;;  %v615_v18 = vpop.xlane.xlu0 %614 }
 0x2d1   : > { %v1116_v31 = vadd.f32 %v1112_v29, %v2753_v20  ;;  %v621_v58 = vmin.f32 %v615_v18, %v2763_v45 }
 0x2d3   : > { %vm625_vm5 = vcmp.gt.f32.partialorder %v621_v58, 0.0  ;;  %v629_v3 = vmul.f32 %v621_v58, %v2755_v24 }
 0x2d5   : > { %v633_v59 = vsel %vm625_vm5, %v629_v3, 0.0 }
 0x2d6   : > { %v637_v14 = vadd.f32 %v633_v59, %v2768_v35 }
 0x2d8   : > { %v619_v52 = vpop.xlane.xlu2 %618 }
 0x2d9   : > { %v623_v33 = vmin.f32 %v619_v52, %v2766_v44 }
 0x2db   : > { %vm627_vm6 = vcmp.gt.f32.partialorder %v623_v33, 0.0  ;;  %v631_v32 = vmul.f32 %v623_v33, %v2772_v36 }
 0x2dd   : > { %v635_v6 = vsel %vm627_vm6, %v631_v32, 0.0 }
 0x2de   : > { %v2956_v48 = vadd.f32 %v635_v6, %v2770_v60 }
 0x2e9   : > { %v1095_v43 = vpop.xlane.xlu2 %1094 }
 0x2ea   : > { %v1101_v20 = vmin.f32 %v1095_v43, %v2797_v26  ;;  %v935_v45 = vpop.xlane.xlu0 %934  ;;  %v3208_v43 = vld [vmem:[#allocation22_spill] sm:$0xff] }
 0x2eb   : > { %v941_v5 = vmin.f32 %v935_v45, %v2781_v10 }
 0x2ec   : > { %vm1105_vm7 = vcmp.gt.f32.partialorder %v1101_v20, 0.0  ;;  %v1109_v24 = vmul.f32 %v1101_v20, %v2785_v21  ;;  %v3209_v20 = vld [vmem:[#allocation32_spill] sm:$0xff] }
 0x2ed   : > { %vm945_vm8 = vcmp.gt.f32.partialorder %v941_v5, 0.0  ;;  %v949_v35 = vmul.f32 %v941_v5, %v2788_v38 }
 0x2ee   : > { %v1113_v44 = vsel %vm1105_vm7, %v1109_v24, 0.0  ;;  %vm1300_vm7 = vcmask 39936  }
 0x2ef   : > { %v1117_v8 = vadd.f32 %v1113_v44, %v2800_v19  ;;  %v953_v36 = vsel %vm945_vm8, %v949_v35, 0.0  ;;  %v3211_v44 = vld [vmem:[#allocation31_spill] sm:$0xff] }
 0x2f0   : > { %v957_v0 = vadd.f32 %v953_v36, %v2783_v17 }
 0x2f1   : > { %v773_v60 = vpop.xlane.xlu2 %772 }
 0x2f2   : > { %v780_v9 = vmin.f32 %v773_v60, %v2811_v27  ;;  %v3212_v60 = vld [vmem:[#allocation34_spill] sm:$0xff] }
 0x2f4   : > { %vm784_vm9 = vcmp.gt.f32.partialorder %v780_v9, 0.0  ;;  %v788_v26 = vmul.f32 %v780_v9, %v2802_v22 }
 0x2f6   : > { %v792_v10 = vsel %vm784_vm9, %v788_v26, 0.0  ;;  %v3213_v26 = vld [vmem:[#allocation49_spill] sm:$0xff] }
 0x2f7   : > { %v796_v21 = vadd.f32 %v792_v10, %v2813_v62 }
 0x2f9   : > { %v1281_v38 = vsel %vm1280_vm10, %v636_v55, %v796_v21  ;;  %v1253_v23 = vpop.xlane.xlu2 %1252 }
 0x2fa   : > { %v1286_v19 = vsel %vm1285_vm11, %v1281_v38, %v956_v61  ;;  %v1260_v54 = vmin.f32 %v1253_v23, %v2823_v34 }
 0x2fb   : > { %v1291_v17 = vsel %vm1290_vm12, %v1286_v19, %v1116_v31  ;;  %v3214_v19 = vld [vmem:[#allocation30_spill] sm:$0xff] }
 0x2fc   : > { %vm1264_vm13 = vcmp.gt.f32.partialorder %v1260_v54, 0.0  ;;  %v1268_v27 = vmul.f32 %v1260_v54, %v2815_v7 }
 0x2fe   : > { %v1272_v22 = vsel %vm1264_vm13, %v1268_v27, 0.0 }
 0x2ff   : > { %v1276_v37 = vadd.f32 %v1272_v22, %v2829_v11 }
 0x301   : > { %v1296_v63 = vsel %vm1295_vm14, %v1291_v17, %v1276_v37  ;;  %v937_v62 = vpop.xlane.xlu1 %936  ;;  %v1097_v1 = vpop.xlane.xlu0 %1096 }
 0x302   : > { %v942_v55 = vmin.f32 %v937_v62, %v2827_v57  ;;  %v1102_v30 = vmin.f32 %v1097_v1, %v2847_v25 }
 0x304   : > { %vm946_vm15 = vcmp.gt.f32.partialorder %v942_v55, 0.0  ;;  %v950_v34 = vmul.f32 %v942_v55, %v2833_v15  ;;  %vm1106_vm0 = vcmp.gt.f32.partialorder %v1102_v30, 0.0  ;;  %v1110_v61 = vmul.f32 %v1102_v30, %v2835_v12 }
 0x305   : > { %v1301_v30 = vsel %vm1300_vm7, %v1296_v63, 0.0 }
 0x306   : > { %v954_v29 = vsel %vm946_vm15, %v950_v34, 0.0  ;;  %v1114_v7 = vsel %vm1106_vm0, %v1110_v61, 0.0 }
 0x307   : > { %v958_v18 = vadd.f32 %v954_v29, %v2831_v4  ;;  %v1118_v11 = vadd.f32 %v1114_v7, %v2849_v28  ;;  %v3207_v28 = vld [vmem:[#allocation21_spill] sm:$0xff]  ;;  %v3217_v7 = vld [vmem:[#allocation48_spill] sm:$0xff] }
 0x309   : > { %v775_v31 = vpop.xlane.xlu0 %774 }
 0x30a   : > { %v781_v58 = vmin.f32 %v775_v31, %v2860_v41 }
 0x30c   : > { %vm785_vm1 = vcmp.gt.f32.partialorder %v781_v58, 0.0  ;;  %v789_v57 = vmul.f32 %v781_v58, %v2851_v40  ;;  %v3219_v58 = vld [vmem:[#allocation28_spill] sm:$0xff] }
 0x30e   : > { %v793_v3 = vsel %vm785_vm1, %v789_v57, 0.0 }
 0x30f   : > { %v797_v25 = vadd.f32 %v793_v3, %v2866_v13 }
 0x311   : > { %v1282_v15 = vsel %vm1280_vm10, %v637_v14, %v797_v25 }
 0x312   : > { %v1287_v59 = vsel %vm1285_vm11, %v1282_v15, %v957_v0  ;;  %v1099_v12 = vpop.xlane.xlu1 %1098 }
 0x313   : > { %v1103_v52 = vmin.f32 %v1099_v12, %v2898_v42  ;;  %v1292_v4 = vsel %vm1290_vm12, %v1287_v59, %v1117_v8  ;;  %v3210_v42 = vld [vmem:[#allocation35_spill] sm:$0xff] }
 0x315   : > { %vm1107_vm2 = vcmp.gt.f32.partialorder %v1103_v52, 0.0  ;;  %v1111_v33 = vmul.f32 %v1103_v52, %v3207_v28 }
 0x317   : > { %v1115_v32 = vsel %vm1107_vm2, %v1111_v33, 0.0 }
 0x318   : > { %v2989_v41 = vadd.f32 %v1115_v32, %v2900_v2 }
 0x319   : > { %v939_v40 = vpop.xlane.xlu0 %938 }
 0x31a   : > { %v777_v6 = vpop.xlane.xlu1 %776  ;;  %v943_v13 = vmin.f32 %v939_v40, %v3208_v43  ;;  %v3221_v40 = vld [vmem:[#allocation26_spill] sm:$0xff] }
 0x31b   : > { %v782_v14 = vmin.f32 %v777_v6, %v2914_v39  ;;  %v671_v39 = vmin.f32 %v3213_v26, 3.0 }
 0x31c   : > { %vm947_vm3 = vcmp.gt.f32.partialorder %v943_v13, 0.0  ;;  %v951_v45 = vmul.f32 %v943_v13, %v3209_v20 }
 0x31d   : > { %vm786_vm4 = vcmp.gt.f32.partialorder %v782_v14, 0.0  ;;  %v790_v5 = vmul.f32 %v782_v14, %v3210_v42  ;;  %v691_v37 = vsub.f32 3.0, %v671_v39  ;;  %v679_v57 = vmul.f32 %v671_v39, %v3219_v58 }
 0x31e   : > { %v955_v24 = vsel %vm947_vm3, %v951_v45, 0.0  ;;  %vm675_vm9 = vcmp.gt.f32.partialorder %v671_v39, 0.0 }
 0x31f   : > { %v794_v35 = vsel %vm786_vm4, %v790_v5, 0.0  ;;  %v959_v8 = vadd.f32 %v955_v24, %v3211_v44  ;;  %v683_v59 = vsel %vm675_vm9, %v679_v57, 0.0 }
 0x320   : > { %v798_v36 = vadd.f32 %v794_v35, %v2918_v53  ;;  %v3215_v53 = vld [vmem:[#allocation23_spill] sm:$0xff] }
 0x321   : > { %v1255_v2 = vpop.xlane.xlu0 %1254 }
 0x322   : > { %v1283_v0 = vsel %vm1280_vm10, %v2942_v56, %v798_v36  ;;  %v1261_v9 = vmin.f32 %v1255_v2, %v3212_v60  ;;  %v3216_v56 = vld [vmem:[#allocation29_spill] sm:$0xff] }
 0x323   : > { %v1288_v10 = vsel %vm1285_vm11, %v1283_v0, %v958_v18  ;;  %v1257_v21 = vpop.xlane.xlu1 %1256  ;;  %v1151_v18 = vmin.f32 %v3217_v7, 3.0 }
 0x324   : > { %v1262_v38 = vmin.f32 %v1257_v21, %v2916_v50  ;;  %v1293_v23 = vsel %vm1290_vm12, %v1288_v10, %v1118_v11  ;;  %vm1265_vm5 = vcmp.gt.f32.partialorder %v1261_v9, 0.0  ;;  %v1269_v54 = vmul.f32 %v1261_v9, %v3214_v19  ;;  %v3218_v11 = vld [vmem:[#allocation46_spill] sm:$0xff] }
 0x325   : > { %v727_v50 = vmin.f32 %v2939_v16, %v691_v37  ;;  %v1171_v3 = vsub.f32 3.0, %v1151_v18  ;;  %v1159_v6 = vmul.f32 %v1151_v18, %v3221_v40  ;;  %vm1155_vm0 = vcmp.gt.f32.partialorder %v1151_v18, 0.0 }
 0x326   : > { %vm1266_vm6 = vcmp.gt.f32.partialorder %v1262_v38, 0.0  ;;  %v1270_v17 = vmul.f32 %v1262_v38, %v3215_v53  ;;  %v1273_v27 = vsel %vm1265_vm5, %v1269_v54, 0.0 }
 0x327   : > { %v1277_v22 = vadd.f32 %v1273_v27, %v3216_v56  ;;  %v735_v31 = vmul.f32 %v727_v50, %v3218_v11  ;;  %vm731_vm8 = vcmp.gt.f32.partialorder %v727_v50, 0.0  ;;  %v1207_v16 = vmin.f32 %v2924_v51, %v1171_v3 }
 0x328   : > { %v1274_v62 = vsel %vm1266_vm6, %v1270_v17, 0.0  ;;  %v1163_v5 = vsel %vm1155_vm0, %v1159_v6, 0.0 }
 0x329   : > { %v1278_v1 = vadd.f32 %v1274_v62, %v2920_v46  ;;  %v1297_v55 = vsel %vm1295_vm14, %v1292_v4, %v1277_v22  ;;  %v747_v46 = vsub.f32 %v691_v37, %v727_v50  ;;  %v739_v15 = vsel %vm731_vm8, %v735_v31, 0.0  ;;  %v3220_v4 = vld [vmem:[#allocation41_spill] sm:$0xff] }
 0x32a   : > { %v1302_v34 = vsel %vm1300_vm7, %v1297_v55, 0.0  ;;  %v743_v52 = vadd.f32 %v739_v15, %v683_v59  ;;  %v1215_v28 = vmul.f32 %v1207_v16, %v3220_v4  ;;  %vm1211_vm15 = vcmp.gt.f32.partialorder %v1207_v16, 0.0 }
 0x32b   : > { %v1298_v61 = vsel %vm1295_vm14, %v1293_v23, %v1278_v1  ;;  %v1303_v29 = vadd.f32 %v1302_v34, %v1301_v30  ;;  %v1227_v43 = vsub.f32 %v1171_v3, %v1207_v16 }
 0x32c   : > { %v1219_v20 = vsel %vm1211_vm15, %v1215_v28, 0.0  ;;  %v1310_v60 = vsel %vm1300_vm7, %v1298_v61, 0.0 }
 0x32d   : > { %v1304_v13 = vrot.slane %v1303_v29, 4  ;;  %v1223_v44 = vadd.f32 %v1219_v20, %v1163_v5 }
 0x32f   : > { %v1305_v35 = vadd.f32 %v1304_v13, %v1303_v29 }
 0x331   : > { %v779_v25 = vpop.xlane.xlu2 %778 }
 0x332   : > { %v783_v63 = vmin.f32 %v779_v25, %v747_v46 }
 0x334   : > { %vm787_vm13 = vcmp.gt.f32.partialorder %v783_v63, 0.0  ;;  %v791_v12 = vmul.f32 %v783_v63, %v2926_v47 }
 0x336   : > { %v795_v33 = vsel %vm787_vm13, %v791_v12, 0.0 }
 0x337   : > { %v799_v32 = vadd.f32 %v795_v33, %v743_v52 }
 0x339   : > { %v1284_v51 = vsel %vm1280_vm10, %v2956_v48, %v799_v32  ;;  %v1259_v14 = vpop.xlane.xlu2 %1258  ;;  %v1306_v48 = vrot.slane %v1305_v35, 2  ;;  %vm1323_vm10 = vcmask 1041409  }
 0x33a   : > { %v1289_v45 = vsel %vm1285_vm11, %v1284_v51, %v959_v8  ;;  %v1263_v47 = vmin.f32 %v1259_v14, %v1227_v43  ;;  %vm1326_vm11 = vcmask 33792  }
 0x33b   : > { %v1294_v42 = vsel %vm1290_vm12, %v1289_v45, %v2989_v41  ;;  %v1307_v41 = vadd.f32 %v1306_v48, %v1305_v35 }
 0x33c   : > { %vm1267_vm1 = vcmp.gt.f32.partialorder %v1263_v47, 0.0  ;;  %v1271_v24 = vmul.f32 %v1263_v47, %v2922_v49 }
 0x33d   : > { %v1308_v49 = vrot.slane %v1307_v41, 1 }
 0x33e   : > { %v1275_v36 = vsel %vm1267_vm1, %v1271_v24, 0.0 }
 0x33f   : > { %v1279_v2 = vadd.f32 %v1275_v36, %v1223_v44  ;;  %v1309_v38 = vadd.f32 %v1308_v49, %v1307_v41 }
 0x341   : > { %v1299_v0 = vsel %vm1295_vm14, %v1294_v42, %v1279_v2  ;;  %v1319_v54 = vmul.f32 0.037037037, %v1309_v38 }
 0x342   : > { %v1311_v8 = vsel %vm1300_vm7, %v1299_v0, 0.0 }
 0x343   : > { %v1312_v9 = vadd.f32 %v1311_v8, %v1310_v60 }
 0x345   : > { %v1313_v26 = vrot.slane %v1312_v9, 4 }
 0x347   : > { %v1314_v39 = vadd.f32 %v1313_v26, %v1312_v9 }
 0x349   : > { %v1315_v10 = vrot.slane %v1314_v39, 2 }
 0x34b   : > { %v1316_v21 = vadd.f32 %v1315_v10, %v1314_v39 }
 0x34d   : > { %v1317_v23 = vrot.slane %v1316_v21, 1 }
 0x34f   : > { %v1318_v19 = vadd.f32 %v1317_v23, %v1316_v21 }
 0x351   : > { %v1320_v53 = vmul.f32 0.037037037, %v1318_v19 }
 0x353   : > { %v1324_v17 = vsel %vm1323_vm10, %v1320_v53, %v1319_v54 }
 0x354   : > { %1327 = vst.msk [vmem:[%s264_s20] sm:$0x3] %vm1326_vm11, %v1324_v17 }
 0x355   : > { %1822 = shalt.err (!%p1819_p11)
}
 0x356   : > { %1590 = dma.vmem_to_hbm [thread:$0]  (%p2072_p3), %s1344_s7, 32, %s1346_s10, %s1329_s15  }
 0x357 PF: > { %s3226_s9 = sld [smem:[#allocation13_spill]]  ;;  %p1610_p1 = scmp.ge.s32.totalorder %s1925_s22, 2 }
 0x359   : > { %p1604_p0 = pnand %p1610_p1, %p2038_p12 }
 0x35b   : > { %p1605_p4 = pneg %p1604_p0 }
 0x35d   : > { %s1357_s5 = sand.u32 1, %s3226_s9  }
 0x35e   : > { %s1358_s12 = scalar_lea.sflag [#allocation4], %s1357_s5 }
 0x35f   : > { %1880 = dma.done.wait (%p1605_p4), %s1358_s12, 32  }
 0x360   : > { %1882 = vsyncadd (%p1605_p4), %s1358_s12, 4294967264  ;;  %s22_s22 = sadd.s32 1, %s1925_s22   ;;  %s3228_s18 = sld [smem:[#allocation16_spill]] }
 0x361   : > { %p19_p5 = scmp.ge.s32.totalorder %s22_s22, 6   ;;  %s3229_s20 = sld [smem:[#allocation18_spill]] }
 0x362   : > { %s3230_s6 = sld [smem:[#allocation20_spill]]  ;;  %s3231_s12 = smov %s1889_s13 }
 0x363   : > { %s3232_s13 = smov %s1893_s14  ;;  %s3233_s14 = smov %s2084_s8 }
 0x364   : > { %s3234_s15 = smov %s1901_s16  ;;  %s3235_s16 = smov %s1905_s17 }
 0x365   : > { %s3236_s17 = smov %s2087_s28  ;;  %s3237_s19 = smov %s1921_s21 }
 0x366   :  { %21 = sbr.rel (!%p19_p5) target bundleno = 14 (0xe), region = 94 }
 0x368   : > { %s3238_s21 = smov %s3230_s6 }
 0x36b   :  { %1364 = vsyncpa [#allocation3], 1 }
 0x36c   :  { %1366 = vsyncpa [#allocation3 + $0x1], 1 }
 0x36d   :  { %1367 = vsyncpa [#allocation6], 1 }
 0x36e   :  { %1369 = vsyncpa [#allocation6 + $0x1], 1 }
 0x36f   :  { %1370 = vsyncpa [#allocation4], 1 }
 0x370   :  { %1372 = vsyncpa [#allocation4 + $0x1], 1 }

</bundles_post_ra>
